<compile_context>
chip_gen: v7x
topology: tpu7x:2x2x1
jax: 0.10.0
libtpu: 0.0.40
codegen_flags: <defaults>
</compile_context>

<pallas_src>
import functools

import jax
import jax.numpy as jnp
from jax.experimental import pallas as pl
from jax.experimental.pallas import tpu as pltpu

QUAT_BIAS = (1.0, 0.0, 0.0, 0.0, 0.0, 0.0, 0.0)
HEAD_DIM = 7 + 4 + 3   # warp | rotation | scaling (logical fused head width)
HEAD_PAD = 128         # lane-dense padded head width (full vreg lane count)


def _deform_kernel(
    x_ref,                      # (tile_n, s_in + t_in)   bf16  [spatial | temporal]
    w1_ref, b1_ref,             # (s_in+t_in, 2W) bf16 ; (1, 2W) f32
    grid_w_ref, grid_b_ref,     # (depth, W, W) bf16 ; (depth, 1, W) bf16/f32
    w_head_ref, b_head_ref,     # (W, HEAD_PAD) bf16 ; (1, HEAD_PAD) f32
    head_ref,                   # (tile_n, HEAD_PAD) f32 output
    *, depth: int, width: int, bf16_elementwise: bool,
):
    # Fused first layer: block-diagonal [w_sp | 0 ; 0 | w_tmp] fills all 2*W
    # output lanes of one MXU pass; f32 accumulate, f32 bias.
    st = jnp.dot(x_ref[...], w1_ref[...],
                 preferred_element_type=jnp.float32) + b1_ref[...]

    # spatial half: sigmoid(x)*2-1 == tanh(x/2)  (directional=True)
    sp = jnp.tanh(st[:, :width] * 0.5)
    # temporal half: ReLU
    tm = jnp.maximum(st[:, width:], 0.0)

    h = (tm * sp).astype(jnp.bfloat16)

    # grid MLP (depth is a static Python int -> unrolled).
    # TODO(synk): for depth > ~4 switch to lax.fori_loop(..., unroll=True) over
    # a dynamic first-axis index to bound vreg live ranges.
    for d in range(depth):
        acc = jnp.dot(h, grid_w_ref[d], preferred_element_type=jnp.float32)
        if bf16_elementwise:
            # v6e/v7x: bf16-native VPU — bias add / relu / carry in bf16.
            h = jnp.maximum(acc.astype(jnp.bfloat16) + grid_b_ref[d], 0.0)
        else:
            # v5e: keep elementwise math in f32, cast once for the next matmul.
            h = jnp.maximum(acc + grid_b_ref[d], 0.0).astype(jnp.bfloat16)

    # fused heads, zero-padded to 128 lanes -> full unmasked vector stores.
    # quat_bias is already folded into b_head on the host.
    head_ref[...] = (jnp.dot(h, w_head_ref[...],
                             preferred_element_type=jnp.float32)
                     + b_head_ref[...])


def init_params(key, spatial_in_dim, temporal_in_dim, depth, width):
    """Deterministic synthetic parameters (f32 master copies). Weights are [in, out]."""
    ks = jax.random.split(key, 12)
    s = 0.05

    def w(k, shape):
        return jax.random.normal(k, shape, dtype=jnp.float32) * s

    params = dict(
        w_sp=w(ks[0], (spatial_in_dim, width)),
        b_sp=w(ks[1], (1, width)),
        w_tmp=w(ks[2], (temporal_in_dim, width)),
        b_tmp=w(ks[3], (1, width)),
        grid_w=w(ks[4], (depth, width, width)),
        grid_b=w(ks[5], (depth, 1, width)),
        w_warp=w(ks[6], (width, 7)),
        b_warp=w(ks[7], (1, 7)),
        w_rot=w(ks[8], (width, 4)),
        b_rot=w(ks[9], (1, 4)),
        w_scale=w(ks[10], (width, 3)),
        b_scale=w(ks[11], (1, 3)),
    )
    return params


def _choose_tile_n(n, tile_n):
    """Clamp tile_n so the grid has >=2 steps when possible (v7x: 2 TCs).

    Keeps tile_n a multiple of 8 (sublane constraint on the second-to-last dim).
    """
    if n <= tile_n:
        half = max(8, pl.cdiv(pl.cdiv(n, 2), 8) * 8)
        tile_n = min(tile_n, half)
    return tile_n


def deform_network_forward(spatial_h, temporal_h, params, *, depth, width,
                           tile_n=1024, bf16_elementwise=True):
    assert width % 128 == 0, "fused first layer assumes width is a multiple of 128"
    N, s_in = spatial_h.shape
    _, t_in = temporal_h.shape

    tile_n = _choose_tile_n(N, tile_n)
    n_pad = pl.cdiv(N, tile_n) * tile_n

    # Concatenate inputs once on the host: one input stream, one first-layer dot.
    x = jnp.concatenate([spatial_h, temporal_h], axis=1)
    if n_pad != N:
        x = jnp.pad(x, ((0, n_pad - N), (0, 0)))
    x_bf = x.astype(jnp.bfloat16)

    # Block-diagonal first-layer weight: [w_sp | 0 ; 0 | w_tmp] -> (s_in+t_in, 2W).
    w1 = jnp.zeros((s_in + t_in, 2 * width), jnp.float32)
    w1 = w1.at[:s_in, :width].set(params["w_sp"])
    w1 = w1.at[s_in:, width:].set(params["w_tmp"])
    w1 = w1.astype(jnp.bfloat16)
    b1 = jnp.concatenate([params["b_sp"], params["b_tmp"]], axis=1)   # f32

    grid_w = params["grid_w"].astype(jnp.bfloat16)
    grid_b = (params["grid_b"].astype(jnp.bfloat16)
              if bf16_elementwise else params["grid_b"])

    # Fused heads padded to 128 lanes; fold quat_bias into the warp bias so no
    # constant is captured inside the kernel.
    quat = jnp.asarray(QUAT_BIAS, dtype=jnp.float32).reshape(1, 7)
    pad_w = jnp.zeros((width, HEAD_PAD - HEAD_DIM), jnp.float32)
    pad_b = jnp.zeros((1, HEAD_PAD - HEAD_DIM), jnp.float32)
    w_head = jnp.concatenate(
        [params["w_warp"], params["w_rot"], params["w_scale"], pad_w], axis=1
    ).astype(jnp.bfloat16)
    b_head = jnp.concatenate(
        [params["b_warp"] + quat, params["b_rot"], params["b_scale"], pad_b], axis=1)

    kernel = functools.partial(_deform_kernel, depth=depth, width=width,
                               bf16_elementwise=bf16_elementwise)

    def rows(block_last):
        return pl.BlockSpec((tile_n, block_last), lambda i: (i, 0))

    def full(shape):
        nd = len(shape)
        return pl.BlockSpec(shape, lambda i: (0,) * nd)

    in_specs = [
        rows(s_in + t_in),                                     # x (bf16)
        full((s_in + t_in, 2 * width)), full((1, 2 * width)),  # fused first layer
        full((depth, width, width)), full((depth, 1, width)),  # grid_mlp
        full((width, HEAD_PAD)), full((1, HEAD_PAD)),          # fused padded heads
    ]
    out_specs = rows(HEAD_PAD)
    out_shape = jax.ShapeDtypeStruct((n_pad, HEAD_PAD), jnp.float32)

    fn = pl.pallas_call(
        kernel,
        out_shape=out_shape,
        grid_spec=pltpu.PrefetchScalarGridSpec(
            num_scalar_prefetch=0,
            grid=(n_pad // tile_n,),
            in_specs=in_specs,
            out_specs=out_specs,
        ),
        compiler_params=pltpu.CompilerParams(
            dimension_semantics=("parallel",)),
    )

    head = fn(x_bf, w1, b1, grid_w, grid_b, w_head, b_head)

    head = head[:N]
    d_xyz = head[:, :7]
    rotation = head[:, 7:11]
    scaling = head[:, 11:14]
    return d_xyz, rotation, scaling


def deform_network_reference(spatial_h, temporal_h, params, *, depth):
    """Pure-JAX f32 reference matching the PyTorch forward."""
    sp = spatial_h @ params["w_sp"] + params["b_sp"]
    sp = jax.nn.sigmoid(sp) * 2.0 - 1.0
    tm = jnp.maximum(temporal_h @ params["w_tmp"] + params["b_tmp"], 0.0)
    h = tm * sp
    for d in range(depth):
        h = jnp.maximum(h @ params["grid_w"][d] + params["grid_b"][d], 0.0)
    quat_bias = jnp.asarray(QUAT_BIAS, dtype=jnp.float32).reshape(1, 7)
    d_xyz = h @ params["w_warp"] + params["b_warp"] + quat_bias
    rotation = h @ params["w_rot"] + params["b_rot"]
    scaling = h @ params["w_scale"] + params["b_scale"]
    return d_xyz, rotation, scaling


if __name__ == "__main__":
    # Small shapes consistent with the module (N gaussians, embedded inputs).
    # N is deliberately not a multiple of tile_n to exercise padding and the
    # >=2-grid-step clamp (tile_n 1024 -> 256 here, 2 grid steps).
    N = 500
    SPATIAL_IN = 32
    TEMPORAL_IN = 16
    DEPTH = 2
    WIDTH = 128

    key = jax.random.PRNGKey(0)
    k_sp, k_tm, k_par = jax.random.split(key, 3)

    spatial_h = jax.random.normal(k_sp, (N, SPATIAL_IN), dtype=jnp.float32)
    temporal_h = jax.random.normal(k_tm, (N, TEMPORAL_IN), dtype=jnp.float32)
    params = init_params(k_par, SPATIAL_IN, TEMPORAL_IN, DEPTH, WIDTH)

    d_xyz, rotation, scaling = deform_network_forward(
        spatial_h, temporal_h, params, depth=DEPTH, width=WIDTH)
    jax.block_until_ready((d_xyz, rotation, scaling))

    r_dxyz, r_rot, r_scale = deform_network_reference(
        spatial_h, temporal_h, params, depth=DEPTH)

    assert d_xyz.shape == (N, 7) and rotation.shape == (N, 4) and scaling.shape == (N, 3)
    # bf16 MXU operands / bf16 grid-layer elementwise (f32 accumulate)
    # -> loosened tolerances vs the f32 reference.
    assert jnp.allclose(d_xyz, r_dxyz, atol=2e-2, rtol=2e-2)
    assert jnp.allclose(rotation, r_rot, atol=2e-2, rtol=2e-2)
    assert jnp.allclose(scaling, r_scale, atol=2e-2, rtol=2e-2)

    # TODO(synk): fixed_attention=True caches attention_score across calls
    # (stateful module attribute); not modeled in this stateless kernel.
    print("KERNEL_OK")
</pallas_src>

<mosaic_0001>
module attributes {stable_mosaic.version = 11 : i64} {
  func.func @_deform_kernel(%arg0: i32, %arg1: memref<256x48xbf16, #tpu.memory_space<vmem>>, %arg2: memref<48x256xbf16, #tpu.memory_space<vmem>>, %arg3: memref<1x256xf32, #tpu.memory_space<vmem>>, %arg4: memref<2x128x128xbf16, #tpu.memory_space<vmem>>, %arg5: memref<2x1x128xbf16, #tpu.memory_space<vmem>>, %arg6: memref<128x128xbf16, #tpu.memory_space<vmem>>, %arg7: memref<1x128xf32, #tpu.memory_space<vmem>>, %arg8: memref<256x128xf32, #tpu.memory_space<vmem>>) attributes {dimension_semantics = [#tpu.dimension_semantics<parallel>], iteration_bounds = array<i64: 2>, scalar_prefetch = 0 : i64, scratch_operands = 0 : i64, tpu.core_type = #tpu.core_type<tc>, window_params = [{transform_indices = @transform_0, window_bounds = array<i64: 256, 48>}, {pipeline_mode = #tpu.pipeline_mode<synchronous>, transform_indices = @transform_1, window_bounds = array<i64: 48, 256>}, {pipeline_mode = #tpu.pipeline_mode<synchronous>, transform_indices = @transform_2, window_bounds = array<i64: 1, 256>}, {pipeline_mode = #tpu.pipeline_mode<synchronous>, transform_indices = @transform_3, window_bounds = array<i64: 2, 128, 128>}, {pipeline_mode = #tpu.pipeline_mode<synchronous>, transform_indices = @transform_4, window_bounds = array<i64: 2, 1, 128>}, {pipeline_mode = #tpu.pipeline_mode<synchronous>, transform_indices = @transform_5, window_bounds = array<i64: 128, 128>}, {pipeline_mode = #tpu.pipeline_mode<synchronous>, transform_indices = @transform_6, window_bounds = array<i64: 1, 128>}, {transform_indices = @transform_7, window_bounds = array<i64: 256, 128>}]} {
    %c0 = arith.constant 0 : index
    %c0_0 = arith.constant 0 : index
    %0 = vector.load %arg1[%c0, %c0_0] : memref<256x48xbf16, #tpu.memory_space<vmem>>, vector<256x48xbf16>
    %c0_1 = arith.constant 0 : index
    %c0_2 = arith.constant 0 : index
    %1 = vector.load %arg2[%c0_1, %c0_2] : memref<48x256xbf16, #tpu.memory_space<vmem>>, vector<48x256xbf16>
    %cst = arith.constant dense<0.000000e+00> : vector<256x256xf32>
    %2 = tpu.matmul %0, %1, %cst {dimension_numbers = #tpu.dot_dimension_numbers<[1], [0], [0], [1], [0, 0, 1, 1], [], []>} : vector<256x48xbf16>, vector<48x256xbf16>, vector<256x256xf32> -> vector<256x256xf32>
    %c0_3 = arith.constant 0 : index
    %c0_4 = arith.constant 0 : index
    %3 = vector.load %arg3[%c0_3, %c0_4] : memref<1x256xf32, #tpu.memory_space<vmem>>, vector<1x256xf32>
    %4 = vector.broadcast %3 : vector<1x256xf32> to vector<256x256xf32>
    %5 = arith.addf %2, %4 : vector<256x256xf32>
    %6 = vector.extract_strided_slice %5 {offsets = [0, 0], sizes = [256, 128], strides = [1, 1]} : vector<256x256xf32> to vector<256x128xf32>
    %cst_5 = arith.constant 5.000000e-01 : f32
    %7 = vector.broadcast %cst_5 : f32 to vector<256x128xf32>
    %8 = arith.mulf %6, %7 : vector<256x128xf32>
    %9 = math.tanh %8 : vector<256x128xf32>
    %10 = vector.extract_strided_slice %5 {offsets = [0, 128], sizes = [256, 128], strides = [1, 1]} : vector<256x256xf32> to vector<256x128xf32>
    %cst_6 = arith.constant 0.000000e+00 : f32
    %11 = vector.broadcast %cst_6 : f32 to vector<256x128xf32>
    %12 = arith.maximumf %10, %11 : vector<256x128xf32>
    %13 = arith.mulf %12, %9 : vector<256x128xf32>
    %14 = arith.truncf %13 : vector<256x128xf32> to vector<256x128xbf16>
    %c0_7 = arith.constant 0 : index
    %c0_8 = arith.constant 0 : index
    %c0_9 = arith.constant 0 : index
    %15 = vector.load %arg4[%c0_7, %c0_8, %c0_9] : memref<2x128x128xbf16, #tpu.memory_space<vmem>>, vector<1x128x128xbf16>
    %16 = vector.shape_cast %15 : vector<1x128x128xbf16> to vector<128x128xbf16>
    %cst_10 = arith.constant dense<0.000000e+00> : vector<256x128xf32>
    %17 = tpu.matmul %14, %16, %cst_10 {dimension_numbers = #tpu.dot_dimension_numbers<[1], [0], [0], [1], [0, 0, 1, 1], [], []>} : vector<256x128xbf16>, vector<128x128xbf16>, vector<256x128xf32> -> vector<256x128xf32>
    %18 = arith.truncf %17 : vector<256x128xf32> to vector<256x128xbf16>
    %c0_11 = arith.constant 0 : index
    %c0_12 = arith.constant 0 : index
    %c0_13 = arith.constant 0 : index
    %19 = vector.load %arg5[%c0_11, %c0_12, %c0_13] : memref<2x1x128xbf16, #tpu.memory_space<vmem>>, vector<1x1x128xbf16>
    %20 = vector.shape_cast %19 : vector<1x1x128xbf16> to vector<1x128xbf16>
    %21 = vector.broadcast %20 : vector<1x128xbf16> to vector<256x128xbf16>
    %22 = arith.addf %18, %21 : vector<256x128xbf16>
    %cst_14 = arith.constant 0.000000e+00 : bf16
    %23 = vector.broadcast %cst_14 : bf16 to vector<256x128xbf16>
    %24 = arith.maximumf %22, %23 : vector<256x128xbf16>
    %c1 = arith.constant 1 : index
    %c0_15 = arith.constant 0 : index
    %c0_16 = arith.constant 0 : index
    %25 = vector.load %arg4[%c1, %c0_15, %c0_16] : memref<2x128x128xbf16, #tpu.memory_space<vmem>>, vector<1x128x128xbf16>
    %26 = vector.shape_cast %25 : vector<1x128x128xbf16> to vector<128x128xbf16>
    %cst_17 = arith.constant dense<0.000000e+00> : vector<256x128xf32>
    %27 = tpu.matmul %24, %26, %cst_17 {dimension_numbers = #tpu.dot_dimension_numbers<[1], [0], [0], [1], [0, 0, 1, 1], [], []>} : vector<256x128xbf16>, vector<128x128xbf16>, vector<256x128xf32> -> vector<256x128xf32>
    %28 = arith.truncf %27 : vector<256x128xf32> to vector<256x128xbf16>
    %c1_18 = arith.constant 1 : index
    %c0_19 = arith.constant 0 : index
    %c0_20 = arith.constant 0 : index
    %29 = vector.load %arg5[%c1_18, %c0_19, %c0_20] : memref<2x1x128xbf16, #tpu.memory_space<vmem>>, vector<1x1x128xbf16>
    %30 = vector.shape_cast %29 : vector<1x1x128xbf16> to vector<1x128xbf16>
    %31 = vector.broadcast %30 : vector<1x128xbf16> to vector<256x128xbf16>
    %32 = arith.addf %28, %31 : vector<256x128xbf16>
    %cst_21 = arith.constant 0.000000e+00 : bf16
    %33 = vector.broadcast %cst_21 : bf16 to vector<256x128xbf16>
    %34 = arith.maximumf %32, %33 : vector<256x128xbf16>
    %c0_22 = arith.constant 0 : index
    %c0_23 = arith.constant 0 : index
    %35 = vector.load %arg6[%c0_22, %c0_23] : memref<128x128xbf16, #tpu.memory_space<vmem>>, vector<128x128xbf16>
    %cst_24 = arith.constant dense<0.000000e+00> : vector<256x128xf32>
    %36 = tpu.matmul %34, %35, %cst_24 {dimension_numbers = #tpu.dot_dimension_numbers<[1], [0], [0], [1], [0, 0, 1, 1], [], []>} : vector<256x128xbf16>, vector<128x128xbf16>, vector<256x128xf32> -> vector<256x128xf32>
    %c0_25 = arith.constant 0 : index
    %c0_26 = arith.constant 0 : index
    %37 = vector.load %arg7[%c0_25, %c0_26] : memref<1x128xf32, #tpu.memory_space<vmem>>, vector<1x128xf32>
    %38 = vector.broadcast %37 : vector<1x128xf32> to vector<256x128xf32>
    %39 = arith.addf %36, %38 : vector<256x128xf32>
    %c0_27 = arith.constant 0 : index
    %c0_28 = arith.constant 0 : index
    %40 = vector.load %arg8[%c0_27, %c0_28] : memref<256x128xf32, #tpu.memory_space<vmem>>, vector<256x128xf32>
    tpu.vector_store %arg8[%c0_27, %c0_28], %39 {strides = array<i32>} : memref<256x128xf32, #tpu.memory_space<vmem>>, vector<256x128xf32>,
    return
  }
  func.func @transform_0(%arg0: i32) -> (i32, i32) {
    %c0_i32 = arith.constant 0 : i32
    %c0_i32_0 = arith.constant 0 : i32
    return %arg0, %c0_i32 : i32, i32
  }
  func.func @transform_1(%arg0: i32) -> (i32, i32) {
    %c0_i32 = arith.constant 0 : i32
    %c0_i32_0 = arith.constant 0 : i32
    %c0_i32_1 = arith.constant 0 : i32
    return %c0_i32, %c0_i32_0 : i32, i32
  }
  func.func @transform_2(%arg0: i32) -> (i32, i32) {
    %c0_i32 = arith.constant 0 : i32
    %c0_i32_0 = arith.constant 0 : i32
    %c0_i32_1 = arith.constant 0 : i32
    return %c0_i32, %c0_i32_0 : i32, i32
  }
  func.func @transform_3(%arg0: i32) -> (i32, i32, i32) {
    %c0_i32 = arith.constant 0 : i32
    %c0_i32_0 = arith.constant 0 : i32
    %c0_i32_1 = arith.constant 0 : i32
    %c0_i32_2 = arith.constant 0 : i32
    return %c0_i32, %c0_i32_0, %c0_i32_1 : i32, i32, i32
  }
  func.func @transform_4(%arg0: i32) -> (i32, i32, i32) {
    %c0_i32 = arith.constant 0 : i32
    %c0_i32_0 = arith.constant 0 : i32
    %c0_i32_1 = arith.constant 0 : i32
    %c0_i32_2 = arith.constant 0 : i32
    return %c0_i32, %c0_i32_0, %c0_i32_1 : i32, i32, i32
  }
  func.func @transform_5(%arg0: i32) -> (i32, i32) {
    %c0_i32 = arith.constant 0 : i32
    %c0_i32_0 = arith.constant 0 : i32
    %c0_i32_1 = arith.constant 0 : i32
    return %c0_i32, %c0_i32_0 : i32, i32
  }
  func.func @transform_6(%arg0: i32) -> (i32, i32) {
    %c0_i32 = arith.constant 0 : i32
    %c0_i32_0 = arith.constant 0 : i32
    %c0_i32_1 = arith.constant 0 : i32
    return %c0_i32, %c0_i32_0 : i32, i32
  }
  func.func @transform_7(%arg0: i32) -> (i32, i32) {
    %c0_i32 = arith.constant 0 : i32
    %c0_i32_0 = arith.constant 0 : i32
    return %arg0, %c0_i32 : i32, i32
  }
}

</mosaic_0001>

<bundles_post_ra>
// kernel: tpu_custom_call.1
= control target key start
LH: loop header
LB: loop body
LE: loop exit
PB: predicated region body
PF: predicated region fallthrough
CT: control target
= control target key end

     0   :  { %12 = vsyncpa [#allocation3], 0  ;;  %s2817_s0 = inlined_call_operand.vmem [shape: bf16[512,48], index: 0, kind: input, shape index: {}]   ;;  %s2818_s1 = inlined_call_operand.vmem [shape: bf16[48,256], index: 1, kind: input, shape index: {}]   ;;  %s2819_s2 = inlined_call_operand.vmem [shape: f32[1,256], index: 2, kind: input, shape index: {}]   ;;  %s2820_s3 = inlined_call_operand.vmem [shape: bf16[2,128,128], index: 3, kind: input, shape index: {}]   ;;  %s2821_s4 = inlined_call_operand.vmem [shape: bf16[2,1,128], index: 4, kind: input, shape index: {}]   ;;  %s2822_s5 = inlined_call_operand.vmem [shape: bf16[128,128], index: 5, kind: input, shape index: {}]   ;;  %s2823_s6 = inlined_call_operand.vmem [shape: f32[1,128], index: 6, kind: input, shape index: {}]   ;;  %s2824_s7 = inlined_call_operand.hbm [shape: f32[512,128], index: 7, kind: output, shape index: {}]  }
   0x1   :  { %14 = vsyncpa [#allocation3 + $0x1], 0  ;;  %s2309_s24 = smov 0   ;;  %s2311_s25 = smov 0  }
   0x2   :  { %s2313_s26 = smov 0   ;;  %s2315_s27 = smov 0  }
   0x3 LB: > { %s2330_s28 = sadd.s32 4294967295, %s2263_s27   ;;  %s1731_s29 = sadd.s32 4294967294, %s2263_s27   ;;  %s2263_s27 = sphi %s2315_s27, %s2830_s27   ;;  %s2259_s26 = sphi %s2313_s26, %s2829_s26   ;;  %s2255_s25 = sphi %s2311_s25, %s2828_s25   ;;  %s2251_s24 = sphi %s2309_s24, %s2827_s24  }
   0x4   : > { %s2334_s30 = sadd.s32 1, %s2263_s27   ;;  %s179_s8 = sadd.s32 1, %s2259_s26 }
   0x5   : > { %s176_s9 = ssub.s32 %s2263_s27, %s2334_s30  ;;  %p189_p0 = scmp.ne.s32.totalorder %s2259_s26, %s2255_s25 }
   0x6   : > { %p177_p1 = scmp.eq.s32.totalorder %s176_s9, 0  ;;  %p190_p2 = scmp.eq.s32.totalorder %s2330_s28, 1 }
   0x7   : > { %p195_p3 = scmp.ne.s32.totalorder %s2255_s25, %s2251_s24  ;;  %p196_p4 = scmp.eq.s32.totalorder %s1731_s29, 1 }
   0x8   : > { %s2345_s10 = scalar_select %p177_p1, %s2259_s26, %s179_s8  }
   0x9   : > { %p2347_p5 = por %p190_p2, %p189_p0  ;;  %p2351_p6 = por %p196_p4, %p195_p3 }
   0xa   : > { %p1734_p7 = scmp.ge.s32.totalorder %s2263_s27, 1  ;;  %p241_p8 = scmp.lt.s32.totalorder %s2263_s27, 3 }
   0xc   : > { %p242_p9 = pnand %p1734_p7, %p241_p8 }
   0xd   : > { %v2088_v0 = vld [vmem:[%s2818_s1 + $0x4] ss:$8 sps:$4 sm:$0xff] (!%p242_p9)   ;;  %s1736_s15 = sshll.u32 (!%p242_p9), %s2330_s28, 5  ;;  %v2090_v1 = vld [vmem:[%s2818_s1] ss:$8 sps:$4 sm:$0xff] (!%p242_p9)   ;;  %v2265_v2 = vmov (!%p242_p9), 0   ;;  %v321_v31 = vlaneseq (!%p242_p9) }
   0xe   : > { %245 = sbr.rel (%p242_p9) target bundleno = 1040 (0x410), region = 48  ;;  %522 = vmatprep.mubr.bf16.mxu0 (!%p242_p9), %v2265_v2  ;;  %p274_p10 = scmp.lt.s32.totalorder (!%p242_p9), %s1736_s15, 63  ;;  %642 = vmatprep.mubr.bf16.mxu1 (!%p242_p9), %v2265_v2  ;;  %v2091_v3 = vld [vmem:[%s2818_s1 + $0x14] ss:$8 sps:$4 sm:$0xff] (!%p242_p9)   ;;  %v2093_v4 = vld [vmem:[%s2818_s1 + $0x10] ss:$8 sps:$4 sm:$0xff] (!%p242_p9)  }
   0xf   : > { %490 = vmatprep.subr.bf16.mxu0 (!%p242_p9), %v2088_v0  ;;  %2040 = vmatprep.subr.bf16.mxu1 (!%p242_p9), %v2088_v0  ;;  %v2094_v5 = vld [vmem:[%s2818_s1 + $0x24] ss:$8 sps:$4 sm:$0xff] (!%p242_p9)   ;;  %v2096_v6 = vld [vmem:[%s2818_s1 + $0x20] ss:$8 sps:$4 sm:$0xff] (!%p242_p9)   ;;  %vm441_vm0 = vcmask (!%p242_p9), 392192   ;;  %v2115_v25 = vld [vmem:[%s2820_s3 + $0x10] sm:$0xff] (!%p242_p9)  }
  0x10   : > { %491 = vmatpush1.bf16.msra.mxu0 (!%p242_p9), %v2090_v1  ;;  %2043 = vmatpush1.bf16.msra.mxu1 (!%p242_p9), %v2090_v1  ;;  %v2113_v7 = vld [vmem:[%s2820_s3] sm:$0xff] (!%p242_p9)   ;;  %v2114_v23 = vld [vmem:[%s2820_s3 + $0x8] sm:$0xff] (!%p242_p9)   ;;  %v2116_v26 = vld [vmem:[%s2820_s3 + $0x18] sm:$0xff] (!%p242_p9)   ;;  %v322_v32 = vshrl.u32 (!%p242_p9), %v321_v31, 7  ;;  %s270_s14 = sand.u32 (!%p242_p9), 1, %s2255_s25   ;;  %s1823_s19 = sshll.u32 (!%p242_p9), %s2330_s28, 12 }
  0x11   : > { %492 = vmatprep.subr.bf16.mxu0 (!%p242_p9), %v2091_v3  ;;  %2041 = vmatprep.subr.bf16.mxu1 (!%p242_p9), %v2091_v3  ;;  %v2117_v27 = vld [vmem:[%s2820_s3 + $0x20] sm:$0xff] (!%p242_p9)   ;;  %v2118_v28 = vld [vmem:[%s2820_s3 + $0x28] sm:$0xff] (!%p242_p9)   ;;  %v2119_v29 = vld [vmem:[%s2820_s3 + $0x30] sm:$0xff] (!%p242_p9)   ;;  %s1735_s16 = sshll.u32 (!%p242_p9), %s270_s14, 8  ;;  %s2766_s23 = scalar_lea.hbm (!%p242_p9), %s2824_s7, %s1823_s19 }
  0x12   : > { %v2120_v30 = vld [vmem:[%s2820_s3 + $0x38] sm:$0xff] (!%p242_p9)   ;;  %v2453_v33 = vsub.s32 (!%p242_p9), 0, %v322_v32  ;;  %v319_v34 = vld [vmem:[%s2819_s2] sm:$0x3] (!%p242_p9)  ;;  %v327_v40 = vsub.s32 (!%p242_p9), 1, %v322_v32  ;;  %s2776_s28 = scalar_lea.sflag (!%p242_p9), [#allocation3], %s270_s14 }
  0x13   : > { %v2464_v36 = vld [vmem:[%s2820_s3 + $0x40] sm:$0xff] (!%p242_p9)   ;;  %s2266_s8 = smov (!%p242_p9), [#allocation2]  }
  0x14   : > { %493 = vmatpush1.bf16.msra.mxu0 (!%p242_p9), %v2093_v4  ;;  %2044 = vmatpush1.bf16.msra.mxu1 (!%p242_p9), %v2093_v4  ;;  %v2459_v35 = vrot.slane (!%p242_p9), %v319_v34, %v2453_v33  ;;  %v2470_v49 = vrot.slane (!%p242_p9), %v319_v34, %v327_v40  ;;  %s2205_s9 = sshll.u32 (!%p242_p9), %s2266_s8, 4  ;;  %s2206_s9 = int_to_ptr.vmem [resolvable:$false] %s2205_s9 }
  0x15   : > { %s2832_s15 = smov (!%p274_p10, %s1736_s15), 63  ;;  %494 = vmatprep.subr.bf16.mxu0 %v2094_v5  ;;  %2042 = vmatprep.subr.bf16.mxu1 %v2094_v5 }
  0x16   : > { %s1737_s29 = sshll.u32 %s2832_s15, 2  ;;  %s2701_s15 = scalar_lea.vmem [#allocation2], %s1735_s16 }
  0x17   : > { %s2378_s13 = scalar_lea.vmem %s2817_s0, %s1737_s29  ;;  %s1669_s20 = sshll.u32 %s2701_s15, 4  ;;  %s2768_s20 = int_to_ptr.vmem [resolvable:$true] %s1669_s20 }
  0x18   : > { %v2097_v8 = vld [vmem:[%s2378_s13] sm:$0xff]   ;;  %495 = vmatpush1.bf16.msra.mxu0 %v2096_v6  ;;  %2045 = vmatpush1.bf16.msra.mxu1 %v2096_v6  ;;  %v2098_v10 = vld [vmem:[%s2378_s13 + $0x8] sm:$0xff]   ;;  %v2099_v12 = vld [vmem:[%s2378_s13 + $0x10] sm:$0xff]   ;;  %s2201_s29 = scalar_lea.vmem %s2768_s20, 4096  ;;  %p2208_p0 = scmp.lt.s32.totalorder %s2768_s20, %s2206_s9 }
  0x19   : > { %1896 = vmatprep.subr.bf16.mxu1 %v2113_v7  ;;  %v2106_v9 = vld [vmem:[%s2378_s13 + $0x60] sm:$0xff]   ;;  %v2108_v11 = vld [vmem:[%s2378_s13 + $0x68] sm:$0xff]   ;;  %v2110_v13 = vld [vmem:[%s2378_s13 + $0x70] sm:$0xff]   ;;  %p2202_p11 = scmp.ne.s32.totalorder %s2768_s20, %s2201_s29 }
  0x1a   : > { %v2100_v14 = vld [vmem:[%s2378_s13 + $0x18] sm:$0xff]   ;;  %v2101_v16 = vld [vmem:[%s2378_s13 + $0x20] sm:$0xff]   ;;  %v2102_v17 = vld [vmem:[%s2378_s13 + $0x28] sm:$0xff]  }
  0x1b   : > { %1760 = vmatmul.mubr.msk.bf16.vlgmr.msra.gmra.mrb[0].mxu0 %vm441_vm0, %v2097_v8  ;;  %1772 = vmatmul.mubr.msk.bf16.vlgmr.msra.gmra.mrb[0].mxu1 %vm441_vm0, %v2106_v9  ;;  %v2112_v15 = vld [vmem:[%s2378_s13 + $0x78] sm:$0xff]   ;;  %v2103_v18 = vld [vmem:[%s2378_s13 + $0x30] sm:$0xff]   ;;  %v2105_v20 = vld [vmem:[%s2378_s13 + $0x40] sm:$0xff]   ;;  %p2203_p12 = pnand %p2202_p11, %p2347_p5 }
  0x1c   : > { %532 = vmatprep.mubr.bf16.mxu0 %v2265_v2  ;;  %652 = vmatprep.mubr.bf16.mxu1 %v2265_v2  ;;  %v2104_v19 = vld [vmem:[%s2378_s13 + $0x38] sm:$0xff]   ;;  %v2107_v21 = vld [vmem:[%s2378_s13 + $0x48] sm:$0xff]   ;;  %v2109_v22 = vld [vmem:[%s2378_s13 + $0x50] sm:$0xff]  }
  0x1d   : > { %1897 = vmatpush3.bf16.msra.mxu1 %v2113_v7  ;;  %v2111_v24 = vld [vmem:[%s2378_s13 + $0x58] sm:$0xff]   ;;  %p2204_p13 = pneg %p2203_p12  ;;  %s2207_s13 = scalar_lea.vmem %s2206_s9, 8192 }
  0x1e   : > { %1898 = vmatprep.subr.bf16.mxu1 %v2114_v23  ;;  %p2209_p1 = scmp.lt.s32.totalorder %s2207_s13, %s2201_s29 }
  0x20   : > { %p2210_p2 = por %p2209_p1, %p2208_p0 }
  0x21   : > { %1899 = vmatpush3.bf16.msra.mxu1 %v2114_v23 }
  0x22   : > { %1900 = vmatprep.subr.bf16.mxu1 %v2115_v25  ;;  %p2211_p3 = pnand %p2210_p2, %p2204_p13 }
  0x23   : > { %1761 = vmatmul.mubr.msk.bf16.gmra.mrb[4].mxu0 %vm441_vm0, %v2098_v10  ;;  %1773 = vmatmul.mubr.msk.bf16.gmra.mrb[4].mxu1 %vm441_vm0, %v2108_v11 }
  0x24   : > { %542 = vmatprep.mubr.bf16.mxu0 %v2265_v2  ;;  %662 = vmatprep.mubr.bf16.mxu1 %v2265_v2 }
  0x25   : > { %1901 = vmatpush3.bf16.msra.mxu1 %v2115_v25 }
  0x26   : > { %1902 = vmatprep.subr.bf16.mxu1 %v2116_v26 }
  0x29   : > { %1903 = vmatpush3.bf16.msra.mxu1 %v2116_v26 }
  0x2a   : > { %1904 = vmatprep.subr.bf16.mxu1 %v2117_v27 }
  0x2b   : > { %1762 = vmatmul.mubr.msk.bf16.gmra.mrb[8].mxu0 %vm441_vm0, %v2099_v12  ;;  %1774 = vmatmul.mubr.msk.bf16.gmra.mrb[8].mxu1 %vm441_vm0, %v2110_v13 }
  0x2c   : > { %552 = vmatprep.mubr.bf16.mxu0 %v2265_v2  ;;  %672 = vmatprep.mubr.bf16.mxu1 %v2265_v2 }
  0x2d   : > { %1905 = vmatpush3.bf16.msra.mxu1 %v2117_v27 }
  0x2e   : > { %1906 = vmatprep.subr.bf16.mxu1 %v2118_v28 }
  0x31   : > { %1907 = vmatpush3.bf16.msra.mxu1 %v2118_v28 }
  0x32   : > { %1908 = vmatprep.subr.bf16.mxu1 %v2119_v29 }
  0x33   : > { %1763 = vmatmul.mubr.msk.bf16.gmra.mrb[12].mxu0 %vm441_vm0, %v2100_v14  ;;  %1775 = vmatmul.mubr.msk.bf16.gmra.mrb[12].mxu1 %vm441_vm0, %v2112_v15 }
  0x34   : > { %562 = vmatprep.mubr.bf16.mxu0 %v2265_v2 }
  0x35   : > { %1909 = vmatpush3.bf16.msra.mxu1 %v2119_v29 }
  0x36   : > { %1910 = vmatprep.subr.bf16.mxu1 %v2120_v30 }
  0x39   : > { %1911 = vmatpush3.bf16.msra.mxu1 %v2120_v30 }
  0x3a   : > { %1944 = vmatprep.subr.bf16.mxu1 %v2464_v36 }
  0x3b   : > { %1764 = vmatmul.mubr.msk.bf16.gmra.mrb[16].mxu0 %vm441_vm0, %v2101_v16 }
  0x3c   : > { %572 = vmatprep.mubr.bf16.mxu0 %v2265_v2 }
  0x43   : > { %1765 = vmatmul.mubr.msk.bf16.gmra.mrb[20].mxu0 %vm441_vm0, %v2102_v17 }
  0x44   : > { %582 = vmatprep.mubr.bf16.mxu0 %v2265_v2 }
  0x4b   : > { %1766 = vmatmul.mubr.msk.bf16.gmra.mrb[24].mxu0 %vm441_vm0, %v2103_v18 }
  0x4c   : > { %592 = vmatprep.mubr.bf16.mxu0 %v2265_v2 }
  0x53   : > { %1767 = vmatmul.mubr.msk.bf16.gmra.mrb[28].mxu0 %vm441_vm0, %v2104_v19 }
  0x54   : > { %602 = vmatprep.mubr.bf16.mxu0 %v2265_v2 }
  0x5b   : > { %1768 = vmatmul.mubr.msk.bf16.gmra.mrb[32].mxu0 %vm441_vm0, %v2105_v20 }
  0x5c   : > { %612 = vmatprep.mubr.bf16.mxu0 %v2265_v2 }
  0x63   : > { %1769 = vmatmul.mubr.msk.bf16.gmra.mrb[36].mxu0 %vm441_vm0, %v2107_v21 }
  0x64   : > { %622 = vmatprep.mubr.bf16.mxu0 %v2265_v2 }
  0x6b   : > { %1770 = vmatmul.mubr.msk.bf16.gmra.mrb[40].mxu0 %vm441_vm0, %v2109_v22 }
  0x6c   : > { %632 = vmatprep.mubr.bf16.mxu0 %v2265_v2 }
  0x73   : > { %1771 = vmatmul.mubr.msk.bf16.gmra.mrb[44].mxu0 %vm441_vm0, %v2111_v24 }
  0xee   : > { %v524_v37 = vpop.f32.mrb[0].mxu0  ;;  %v644_v45 = vpop.f32.mrb[0].mxu1 }
  0xef   : > { %v525_v38 = vadd.f32 %v524_v37, %v2459_v35  ;;  %v526_v39 = vpop.f32.mrb[1].mxu0  ;;  %v645_v47 = vadd.f32 %v644_v45, %v2459_v35  ;;  %v646_v48 = vpop.f32.mrb[1].mxu1 }
  0xf0   : > { %v528_v41 = vpop.f32.mrb[2].mxu0  ;;  %v648_v50 = vpop.f32.mrb[2].mxu1  ;;  %v527_v58 = vadd.f32 %v526_v39, %v2470_v49  ;;  %v647_v0 = vadd.f32 %v646_v48, %v2470_v49 }
  0xf1   : > { %v683_v42 = vmul.f32 0.5, %v525_v38  ;;  %v529_v43 = vadd.f32 %v528_v41, %v2459_v35  ;;  %v530_v44 = vpop.f32.mrb[3].mxu0  ;;  %v707_v51 = vmul.f32 0.5, %v645_v47  ;;  %v649_v52 = vadd.f32 %v648_v50, %v2459_v35  ;;  %v650_v53 = vpop.f32.mrb[3].mxu1 }
  0xf2   : > { %v531_v63 = vadd.f32 %v530_v44, %v2470_v49  ;;  %v747_v6 = vmax.f32 %v527_v58, 0.0  ;;  %v651_v7 = vadd.f32 %v650_v53, %v2470_v49  ;;  %v771_v16 = vmax.f32 %v647_v0, 0.0 }
  0xf3   : > { %2137 = vtanh.f32 %v683_v42  ;;  %v684_v46 = vmul.f32 0.5, %v529_v43  ;;  %v708_v57 = vmul.f32 0.5, %v649_v52 }
  0xf4   : > { %v748_v14 = vmax.f32 %v531_v63, 0.0  ;;  %v772_v24 = vmax.f32 %v651_v7, 0.0 }
  0xf5   : > { %2139 = vtanh.f32 %v684_v46 }
  0xf6   : > { %v534_v54 = vpop.f32.mrb[4].mxu0  ;;  %2141 = vtanh.f32 %v707_v51  ;;  %v654_v1 = vpop.f32.mrb[4].mxu1 }
  0xf7   : > { %v535_v55 = vadd.f32 %v534_v54, %v2459_v35  ;;  %v536_v56 = vpop.f32.mrb[5].mxu0  ;;  %2143 = vtanh.f32 %v708_v57  ;;  %v655_v4 = vadd.f32 %v654_v1, %v2459_v35  ;;  %v656_v5 = vpop.f32.mrb[5].mxu1 }
  0xf8   : > { %v538_v59 = vpop.f32.mrb[6].mxu0  ;;  %v658_v8 = vpop.f32.mrb[6].mxu1  ;;  %v537_v22 = vadd.f32 %v536_v56, %v2470_v49  ;;  %v657_v32 = vadd.f32 %v656_v5, %v2470_v49 }
  0xf9   : > { %v685_v60 = vmul.f32 0.5, %v535_v55  ;;  %v539_v61 = vadd.f32 %v538_v59, %v2459_v35  ;;  %v540_v62 = vpop.f32.mrb[7].mxu0  ;;  %v709_v10 = vmul.f32 0.5, %v655_v4  ;;  %v659_v11 = vadd.f32 %v658_v8, %v2459_v35  ;;  %v660_v12 = vpop.f32.mrb[7].mxu1 }
  0xfa   : > { %v541_v29 = vadd.f32 %v540_v62, %v2470_v49  ;;  %v749_v41 = vmax.f32 %v537_v22, 0.0  ;;  %v661_v43 = vadd.f32 %v660_v12, %v2470_v49  ;;  %v773_v53 = vmax.f32 %v657_v32, 0.0 }
  0xfb   : > { %2145 = vtanh.f32 %v685_v60  ;;  %v686_v3 = vmul.f32 0.5, %v539_v61  ;;  %v710_v20 = vmul.f32 0.5, %v659_v11 }
  0xfc   : > { %v750_v51 = vmax.f32 %v541_v29, 0.0  ;;  %v774_v62 = vmax.f32 %v661_v43, 0.0 }
  0xfd   : > { %v2138_v9 = vpop.eup %2137  ;;  %2147 = vtanh.f32 %v686_v3 }
  0xfe   : > { %v779_v13 = vmul.f32 %v2138_v9, %v747_v6  ;;  %v544_v15 = vpop.f32.mrb[8].mxu0  ;;  %2149 = vtanh.f32 %v709_v10  ;;  %v664_v34 = vpop.f32.mrb[8].mxu1  ;;  %v2122_v9 = vld [vmem:[%s2820_s3 + $0x48] sm:$0xff]  }
  0xff   : > { %v2140_v17 = vpop.eup %2139  ;;  %v545_v18 = vadd.f32 %v544_v15, %v2459_v35  ;;  %v546_v19 = vpop.f32.mrb[9].mxu0  ;;  %2151 = vtanh.f32 %v710_v20  ;;  %v665_v39 = vadd.f32 %v664_v34, %v2459_v35 }
 0x100   : > { %v780_v21 = vmul.f32 %v2140_v17, %v748_v14  ;;  %v548_v23 = vpop.f32.mrb[10].mxu0  ;;  %v2142_v25 = vpop.eup %2141  ;;  %v547_v60 = vadd.f32 %v546_v19, %v2470_v49 }
 0x101   : > { %v687_v26 = vmul.f32 0.5, %v545_v18  ;;  %v549_v27 = vadd.f32 %v548_v23, %v2459_v35  ;;  %v550_v28 = vpop.f32.mrb[11].mxu0  ;;  %v2485_v31 = vmul.f32 %v2142_v25, %v771_v16  ;;  %v2144_v37 = vpop.eup %2143  ;;  %v711_v46 = vmul.f32 0.5, %v665_v39 }
 0x102   : > { %v811_v30 = vpack.c.bf16 %v780_v21, %v779_v13  ;;  %v666_v40 = vpop.f32.mrb[9].mxu1  ;;  %v2489_v42 = vmul.f32 %v2144_v37, %v772_v24  ;;  %v551_v5 = vadd.f32 %v550_v28, %v2470_v49  ;;  %v751_v14 = vmax.f32 %v547_v60, 0.0 }
 0x103   : > { %2153 = vtanh.f32 %v687_v26  ;;  %v688_v38 = vmul.f32 0.5, %v549_v27  ;;  %v668_v44 = vpop.f32.mrb[10].mxu1  ;;  %v667_v7 = vadd.f32 %v666_v40, %v2470_v49  ;;  %v2123_v27 = vld [vmem:[%s2820_s3 + $0x50] sm:$0xff]  }
 0x104   : > { %1912 = vmatprep.mubr.bf16.mxu1 %v811_v30  ;;  %v669_v47 = vadd.f32 %v668_v44, %v2459_v35  ;;  %v670_v48 = vpop.f32.mrb[11].mxu1  ;;  %v823_v54 = vpack.c.bf16 %v2489_v42, %v2485_v31  ;;  %v752_v23 = vmax.f32 %v551_v5, 0.0  ;;  %v2129_v31 = vld [vmem:[%s2822_s5] sm:$0xff]   ;;  %v2130_v42 = vld [vmem:[%s2822_s5 + $0x8] sm:$0xff]  }
 0x105   : > { %v2146_v45 = vpop.eup %2145  ;;  %2155 = vtanh.f32 %v688_v38  ;;  %v671_v16 = vadd.f32 %v670_v48, %v2470_v49  ;;  %v775_v25 = vmax.f32 %v667_v7, 0.0  ;;  %v2124_v48 = vld [vmem:[%s2820_s3 + $0x58] sm:$0xff]   ;;  %1992 = vmatprep.subr.bf16.mxu0 %v2129_v31 }
 0x106   : > { %v781_v50 = vmul.f32 %v2146_v45, %v749_v41  ;;  %v554_v52 = vpop.f32.mrb[12].mxu0  ;;  %2157 = vtanh.f32 %v711_v46  ;;  %v712_v58 = vmul.f32 0.5, %v669_v47  ;;  %v674_v8 = vpop.f32.mrb[12].mxu1  ;;  %1993 = vmatpush3.bf16.msra.mxu0 %v2129_v31 }
 0x107   : > { %v2148_v55 = vpop.eup %2147  ;;  %v555_v56 = vadd.f32 %v554_v52, %v2459_v35  ;;  %v556_v57 = vpop.f32.mrb[13].mxu0  ;;  %v675_v12 = vadd.f32 %v674_v8, %v2459_v35  ;;  %v776_v38 = vmax.f32 %v671_v16, 0.0  ;;  %v2126_v16 = vld [vmem:[%s2820_s3 + $0x68] sm:$0xff]   ;;  %1994 = vmatprep.subr.bf16.mxu0 %v2130_v42 }
 0x108   : > { %v782_v59 = vmul.f32 %v2148_v55, %v750_v51  ;;  %v558_v61 = vpop.f32.mrb[14].mxu0  ;;  %v2150_v63 = vpop.eup %2149  ;;  %2159 = vtanh.f32 %v712_v58 }
 0x109   : > { %v689_v0 = vmul.f32 0.5, %v555_v56  ;;  %v559_v1 = vadd.f32 %v558_v61, %v2459_v35  ;;  %v560_v3 = vpop.f32.mrb[15].mxu0  ;;  %v2499_v6 = vmul.f32 %v2150_v63, %v773_v53  ;;  %v2152_v10 = vpop.eup %2151  ;;  %v713_v19 = vmul.f32 0.5, %v675_v12 }
 0x10a   : > { %v812_v4 = vpack.c.bf16 %v782_v59, %v781_v50  ;;  %v676_v13 = vpop.f32.mrb[13].mxu1  ;;  %v2506_v15 = vmul.f32 %v2152_v10, %v774_v62  ;;  %v561_v44 = vadd.f32 %v560_v3, %v2470_v49  ;;  %v2125_v62 = vld [vmem:[%s2820_s3 + $0x60] sm:$0xff]   ;;  %1995 = vmatpush3.bf16.msra.mxu0 %v2130_v42 }
 0x10b   : > { %2161 = vtanh.f32 %v689_v0  ;;  %v690_v11 = vmul.f32 0.5, %v559_v1  ;;  %v678_v17 = vpop.f32.mrb[14].mxu1  ;;  %v677_v47 = vadd.f32 %v676_v13, %v2470_v49 }
 0x10c   : > { %1913 = vmatmul.mubr.bf16.vlgmr.msra.gmra.mrb[16].mxu1 %v812_v4  ;;  %v679_v20 = vadd.f32 %v678_v17, %v2459_v35  ;;  %v680_v21 = vpop.f32.mrb[15].mxu1  ;;  %v824_v26 = vpack.c.bf16 %v2506_v15, %v2499_v6  ;;  %v754_v58 = vmax.f32 %v561_v44, 0.0  ;;  %v2132_v6 = vld [vmem:[%s2822_s5 + $0x18] sm:$0xff]   ;;  %v2133_v15 = vld [vmem:[%s2822_s5 + $0x20] sm:$0xff]  }
 0x10d   : > { %v2154_v18 = vpop.eup %2153  ;;  %2163 = vtanh.f32 %v690_v11  ;;  %1945 = vmatpush3.bf16.msra.mxu1 %v2464_v36  ;;  %v557_v36 = vadd.f32 %v556_v57, %v2470_v49  ;;  %v681_v55 = vadd.f32 %v680_v21, %v2470_v49  ;;  %v777_v60 = vmax.f32 %v677_v47, 0.0 }
 0x10e   : > { %v783_v22 = vmul.f32 %v2154_v18, %v751_v14  ;;  %v564_v24 = vpop.f32.mrb[16].mxu0  ;;  %1946 = vmatprep.subr.bf16.mxu1 %v2122_v9  ;;  %2165 = vtanh.f32 %v713_v19  ;;  %v714_v32 = vmul.f32 0.5, %v679_v20 }
 0x10f   : > { %v2156_v28 = vpop.eup %2155  ;;  %v565_v29 = vadd.f32 %v564_v24, %v2459_v35  ;;  %v566_v30 = vpop.f32.mrb[17].mxu0  ;;  %v753_v52 = vmax.f32 %v557_v36, 0.0  ;;  %v778_v7 = vmax.f32 %v681_v55, 0.0 }
 0x110   : > { %v784_v34 = vmul.f32 %v2156_v28, %v752_v23  ;;  %v568_v37 = vpop.f32.mrb[18].mxu0  ;;  %v2158_v39 = vpop.eup %2157  ;;  %2167 = vtanh.f32 %v714_v32  ;;  %v567_v4 = vadd.f32 %v566_v30, %v2470_v49 }
 0x111   : > { %v691_v40 = vmul.f32 0.5, %v565_v29  ;;  %v569_v41 = vadd.f32 %v568_v37, %v2459_v35  ;;  %v570_v43 = vpop.f32.mrb[19].mxu0  ;;  %1947 = vmatpush3.bf16.msra.mxu1 %v2122_v9  ;;  %v2520_v46 = vmul.f32 %v2158_v39, %v775_v25 }
 0x112   : > { %v813_v45 = vpack.c.bf16 %v784_v34, %v783_v22  ;;  %1948 = vmatprep.subr.bf16.mxu1 %v2123_v27  ;;  %v2160_v50 = vpop.eup %2159  ;;  %v571_v12 = vadd.f32 %v570_v43, %v2470_v49  ;;  %v755_v19 = vmax.f32 %v567_v4, 0.0 }
 0x113   : > { %2169 = vtanh.f32 %v691_v40  ;;  %v692_v51 = vmul.f32 0.5, %v569_v41  ;;  %v2526_v53 = vmul.f32 %v2160_v50, %v776_v38 }
 0x114   : > { %1916 = vmatprep.mubr.bf16.mxu1 %v813_v45  ;;  %v756_v23 = vmax.f32 %v571_v12, 0.0 }
 0x115   : > { %v2162_v56 = vpop.eup %2161  ;;  %2171 = vtanh.f32 %v692_v51  ;;  %1949 = vmatpush3.bf16.msra.mxu1 %v2123_v27  ;;  %v825_v61 = vpack.c.bf16 %v2526_v53, %v2520_v46  ;;  %v2134_v46 = vld [vmem:[%s2822_s5 + $0x28] sm:$0xff]  }
 0x116   : > { %v785_v57 = vmul.f32 %v2162_v56, %v753_v52  ;;  %v574_v59 = vpop.f32.mrb[20].mxu0  ;;  %1950 = vmatprep.subr.bf16.mxu1 %v2124_v48 }
 0x117   : > { %v2164_v63 = vpop.eup %2163  ;;  %v575_v0 = vadd.f32 %v574_v59, %v2459_v35  ;;  %v576_v1 = vpop.f32.mrb[21].mxu0 }
 0x118   : > { %v786_v3 = vmul.f32 %v2164_v63, %v754_v58  ;;  %v578_v5 = vpop.f32.mrb[22].mxu0  ;;  %v2166_v8 = vpop.eup %2165  ;;  %v577_v32 = vadd.f32 %v576_v1, %v2470_v49 }
 0x119   : > { %v693_v9 = vmul.f32 0.5, %v575_v0  ;;  %v579_v10 = vadd.f32 %v578_v5, %v2459_v35  ;;  %v580_v11 = vpop.f32.mrb[23].mxu0  ;;  %1951 = vmatpush3.bf16.msra.mxu1 %v2124_v48  ;;  %v2538_v14 = vmul.f32 %v2166_v8, %v777_v60 }
 0x11a   : > { %v814_v13 = vpack.c.bf16 %v786_v3, %v785_v57  ;;  %1952 = vmatprep.subr.bf16.mxu1 %v2125_v62  ;;  %v2168_v17 = vpop.eup %2167  ;;  %v581_v39 = vadd.f32 %v580_v11, %v2470_v49  ;;  %v757_v43 = vmax.f32 %v577_v32, 0.0 }
 0x11b   : > { %2173 = vtanh.f32 %v693_v9  ;;  %v694_v18 = vmul.f32 0.5, %v579_v10  ;;  %v2543_v20 = vmul.f32 %v2168_v17, %v778_v7 }
 0x11c   : > { %1917 = vmatmul.mubr.bf16.gmra.mrb[20].mxu1 %v814_v13  ;;  %v758_v47 = vmax.f32 %v581_v39, 0.0 }
 0x11d   : > { %v2170_v21 = vpop.eup %2169  ;;  %2175 = vtanh.f32 %v694_v18  ;;  %1953 = vmatpush3.bf16.msra.mxu1 %v2125_v62  ;;  %v826_v25 = vpack.c.bf16 %v2543_v20, %v2538_v14 }
 0x11e   : > { %v787_v22 = vmul.f32 %v2170_v21, %v755_v19  ;;  %v584_v24 = vpop.f32.mrb[24].mxu0  ;;  %1954 = vmatprep.subr.bf16.mxu1 %v2126_v16 }
 0x11f   : > { %v2172_v27 = vpop.eup %2171  ;;  %v585_v28 = vadd.f32 %v584_v24, %v2459_v35  ;;  %v586_v29 = vpop.f32.mrb[25].mxu0 }
 0x120   : > { %v788_v30 = vmul.f32 %v2172_v27, %v756_v23  ;;  %v588_v34 = vpop.f32.mrb[26].mxu0  ;;  %v587_v56 = vadd.f32 %v586_v29, %v2470_v49 }
 0x121   : > { %v695_v36 = vmul.f32 0.5, %v585_v28  ;;  %v589_v37 = vadd.f32 %v588_v34, %v2459_v35  ;;  %v590_v38 = vpop.f32.mrb[27].mxu0  ;;  %1955 = vmatpush3.bf16.msra.mxu1 %v2126_v16 }
 0x122   : > { %v815_v40 = vpack.c.bf16 %v788_v30, %v787_v22  ;;  %v591_v62 = vadd.f32 %v590_v38, %v2470_v49  ;;  %v759_v1 = vmax.f32 %v587_v56, 0.0 }
 0x123   : > { %2177 = vtanh.f32 %v695_v36  ;;  %v696_v41 = vmul.f32 0.5, %v589_v37 }
 0x124   : > { %1920 = vmatprep.mubr.bf16.mxu1 %v815_v40  ;;  %v760_v5 = vmax.f32 %v591_v62, 0.0 }
 0x125   : > { %v2174_v44 = vpop.eup %2173  ;;  %2179 = vtanh.f32 %v696_v41 }
 0x126   : > { %v789_v45 = vmul.f32 %v2174_v44, %v757_v43  ;;  %v594_v48 = vpop.f32.mrb[28].mxu0 }
 0x127   : > { %v2176_v50 = vpop.eup %2175  ;;  %v595_v51 = vadd.f32 %v594_v48, %v2459_v35  ;;  %v596_v52 = vpop.f32.mrb[29].mxu0 }
 0x128   : > { %v790_v55 = vmul.f32 %v2176_v50, %v758_v47  ;;  %v598_v57 = vpop.f32.mrb[30].mxu0  ;;  %v597_v12 = vadd.f32 %v596_v52, %v2470_v49 }
 0x129   : > { %v697_v58 = vmul.f32 0.5, %v595_v51  ;;  %v599_v59 = vadd.f32 %v598_v57, %v2459_v35  ;;  %v600_v60 = vpop.f32.mrb[31].mxu0 }
 0x12a   : > { %v816_v63 = vpack.c.bf16 %v790_v55, %v789_v45  ;;  %v601_v19 = vadd.f32 %v600_v60, %v2470_v49  ;;  %v761_v23 = vmax.f32 %v597_v12, 0.0 }
 0x12b   : > { %2181 = vtanh.f32 %v697_v58  ;;  %v698_v0 = vmul.f32 0.5, %v599_v59 }
 0x12c   : > { %1921 = vmatmul.mubr.bf16.gmra.mrb[24].mxu1 %v816_v63  ;;  %v762_v28 = vmax.f32 %v601_v19, 0.0 }
 0x12d   : > { %v2178_v3 = vpop.eup %2177  ;;  %2183 = vtanh.f32 %v698_v0 }
 0x12e   : > { %v791_v4 = vmul.f32 %v2178_v3, %v759_v1  ;;  %v604_v7 = vpop.f32.mrb[32].mxu0 }
 0x12f   : > { %v2180_v8 = vpop.eup %2179  ;;  %v605_v9 = vadd.f32 %v604_v7, %v2459_v35  ;;  %v606_v10 = vpop.f32.mrb[33].mxu0 }
 0x130   : > { %v792_v11 = vmul.f32 %v2180_v8, %v760_v5  ;;  %v608_v13 = vpop.f32.mrb[34].mxu0  ;;  %v607_v37 = vadd.f32 %v606_v10, %v2470_v49 }
 0x131   : > { %v699_v16 = vmul.f32 0.5, %v605_v9  ;;  %v609_v17 = vadd.f32 %v608_v13, %v2459_v35  ;;  %v610_v18 = vpop.f32.mrb[35].mxu0 }
 0x132   : > { %v817_v21 = vpack.c.bf16 %v792_v11, %v791_v4  ;;  %v611_v43 = vadd.f32 %v610_v18, %v2470_v49  ;;  %v763_v47 = vmax.f32 %v607_v37, 0.0 }
 0x133   : > { %2185 = vtanh.f32 %v699_v16  ;;  %v700_v22 = vmul.f32 0.5, %v609_v17 }
 0x134   : > { %1924 = vmatprep.mubr.bf16.mxu1 %v817_v21  ;;  %v764_v51 = vmax.f32 %v611_v43, 0.0 }
 0x135   : > { %v2182_v24 = vpop.eup %2181  ;;  %2187 = vtanh.f32 %v700_v22 }
 0x136   : > { %v793_v27 = vmul.f32 %v2182_v24, %v761_v23  ;;  %v614_v29 = vpop.f32.mrb[36].mxu0 }
 0x137   : > { %v2184_v30 = vpop.eup %2183  ;;  %v615_v32 = vadd.f32 %v614_v29, %v2459_v35  ;;  %v616_v34 = vpop.f32.mrb[37].mxu0 }
 0x138   : > { %v794_v36 = vmul.f32 %v2184_v30, %v762_v28  ;;  %v618_v38 = vpop.f32.mrb[38].mxu0  ;;  %v617_v59 = vadd.f32 %v616_v34, %v2470_v49 }
 0x139   : > { %v701_v39 = vmul.f32 0.5, %v615_v32  ;;  %v619_v40 = vadd.f32 %v618_v38, %v2459_v35  ;;  %v620_v41 = vpop.f32.mrb[39].mxu0 }
 0x13a   : > { %v818_v44 = vpack.c.bf16 %v794_v36, %v793_v27  ;;  %v621_v1 = vadd.f32 %v620_v41, %v2470_v49  ;;  %v765_v5 = vmax.f32 %v617_v59, 0.0 }
 0x13b   : > { %2189 = vtanh.f32 %v701_v39  ;;  %v702_v45 = vmul.f32 0.5, %v619_v40 }
 0x13c   : > { %1925 = vmatmul.mubr.bf16.gmra.mrb[28].mxu1 %v818_v44  ;;  %v766_v9 = vmax.f32 %v621_v1, 0.0 }
 0x13d   : > { %v2186_v48 = vpop.eup %2185  ;;  %2191 = vtanh.f32 %v702_v45 }
 0x13e   : > { %v795_v50 = vmul.f32 %v2186_v48, %v763_v47  ;;  %v624_v52 = vpop.f32.mrb[40].mxu0  ;;  %v2127_v48 = vld [vmem:[%s2820_s3 + $0x70] sm:$0xff]  }
 0x13f   : > { %v2188_v55 = vpop.eup %2187  ;;  %v625_v56 = vadd.f32 %v624_v52, %v2459_v35  ;;  %v626_v57 = vpop.f32.mrb[41].mxu0  ;;  %1956 = vmatprep.subr.bf16.mxu1 %v2127_v48 }
 0x140   : > { %v796_v58 = vmul.f32 %v2188_v55, %v764_v51  ;;  %v628_v60 = vpop.f32.mrb[42].mxu0  ;;  %v627_v17 = vadd.f32 %v626_v57, %v2470_v49  ;;  %1957 = vmatpush3.bf16.msra.mxu1 %v2127_v48 }
 0x141   : > { %v703_v62 = vmul.f32 0.5, %v625_v56  ;;  %v629_v63 = vadd.f32 %v628_v60, %v2459_v35  ;;  %v630_v0 = vpop.f32.mrb[43].mxu0 }
 0x142   : > { %v819_v3 = vpack.c.bf16 %v796_v58, %v795_v50  ;;  %v631_v23 = vadd.f32 %v630_v0, %v2470_v49  ;;  %v767_v28 = vmax.f32 %v627_v17, 0.0 }
 0x143   : > { %2193 = vtanh.f32 %v703_v62  ;;  %v704_v4 = vmul.f32 0.5, %v629_v63 }
 0x144   : > { %1928 = vmatprep.mubr.bf16.mxu1 %v819_v3  ;;  %v768_v32 = vmax.f32 %v631_v23, 0.0 }
 0x145   : > { %v2190_v7 = vpop.eup %2189  ;;  %2195 = vtanh.f32 %v704_v4 }
 0x146   : > { %v797_v8 = vmul.f32 %v2190_v7, %v765_v5  ;;  %v634_v10 = vpop.f32.mrb[44].mxu0 }
 0x147   : > { %v2192_v11 = vpop.eup %2191  ;;  %v635_v12 = vadd.f32 %v634_v10, %v2459_v35  ;;  %v636_v13 = vpop.f32.mrb[45].mxu0 }
 0x148   : > { %v798_v16 = vmul.f32 %v2192_v11, %v766_v9  ;;  %v638_v18 = vpop.f32.mrb[46].mxu0  ;;  %v637_v37 = vadd.f32 %v636_v13, %v2470_v49 }
 0x149   : > { %v705_v19 = vmul.f32 0.5, %v635_v12  ;;  %v639_v21 = vadd.f32 %v638_v18, %v2459_v35  ;;  %v640_v22 = vpop.f32.mrb[47].mxu0 }
 0x14a   : > { %v820_v24 = vpack.c.bf16 %v798_v16, %v797_v8  ;;  %v641_v38 = vadd.f32 %v640_v22, %v2470_v49  ;;  %v769_v35 = vmax.f32 %v637_v37, 0.0  ;;  %v2128_v49 = vld [vmem:[%s2820_s3 + $0x78] sm:$0xff]  }
 0x14b   : > { %2197 = vtanh.f32 %v705_v19  ;;  %v706_v27 = vmul.f32 0.5, %v639_v21  ;;  %1958 = vmatprep.subr.bf16.mxu1 %v2128_v49 }
 0x14c   : > { %1929 = vmatmul.mubr.bf16.gmra.mrb[32].mxu1 %v820_v24  ;;  %v770_v43 = vmax.f32 %v641_v38, 0.0 }
 0x14d   : > { %v2194_v29 = vpop.eup %2193  ;;  %2199 = vtanh.f32 %v706_v27  ;;  %1959 = vmatpush3.bf16.msra.mxu1 %v2128_v49 }
 0x14e   : > { %v799_v30 = vmul.f32 %v2194_v29, %v767_v28 }
 0x14f   : > { %v2196_v34 = vpop.eup %2195 }
 0x150   : > { %v800_v36 = vmul.f32 %v2196_v34, %v768_v32 }
 0x152   : > { %v821_v39 = vpack.c.bf16 %v800_v36, %v799_v30 }
 0x154   : > { %1932 = vmatprep.mubr.bf16.mxu1 %v821_v39 }
 0x155   : > { %v2198_v40 = vpop.eup %2197 }
 0x156   : > { %v801_v41 = vmul.f32 %v2198_v40, %v769_v35 }
 0x157   : > { %v2200_v44 = vpop.eup %2199 }
 0x158   : > { %v802_v45 = vmul.f32 %v2200_v44, %v770_v43 }
 0x15a   : > { %v822_v47 = vpack.c.bf16 %v802_v45, %v801_v41 }
 0x15c   : > { %1933 = vmatmul.mubr.bf16.gmra.mrb[36].mxu1 %v822_v47 }
 0x15d   : > { %1936 = vmatprep.mubr.bf16.mxu1 %v823_v54  ;;  %v2131_v54 = vld [vmem:[%s2822_s5 + $0x10] sm:$0xff]  }
 0x15e   : > { %1996 = vmatprep.subr.bf16.mxu0 %v2131_v54 }
 0x15f   : > { %1997 = vmatpush3.bf16.msra.mxu0 %v2131_v54 }
 0x160   : > { %1998 = vmatprep.subr.bf16.mxu0 %v2132_v6 }
 0x163   : > { %1999 = vmatpush3.bf16.msra.mxu0 %v2132_v6 }
 0x164   : > { %1937 = vmatmul.mubr.bf16.gmra.mrb[40].mxu1 %v824_v26  ;;  %v1068_v26 = vld [vmem:[%s2821_s4] sm:$0x1]  ;;  %2000 = vmatprep.subr.bf16.mxu0 %v2133_v15 }
 0x165   : > { %1940 = vmatprep.mubr.bf16.mxu1 %v825_v61  ;;  %v1070_v53 = vpack.i.b16 %v1068_v26, %v1068_v26 }
 0x167   : > { %2001 = vmatpush3.bf16.msra.mxu0 %v2133_v15  ;;  %v2613_v20 = vrot.slane %v1070_v53, %v2453_v33 }
 0x168   : > { %2002 = vmatprep.subr.bf16.mxu0 %v2134_v46 }
 0x16b   : > { %2003 = vmatpush3.bf16.msra.mxu0 %v2134_v46 }
 0x16c   : > { %1941 = vmatmul.mubr.bf16.gmra.mrb[44].mxu1 %v826_v25 }
 0x1df   : > { %v1914_v61 = vpop.f32.mrb[16].mxu1 }
 0x1e0   : > { %v925_v14 = vpop.f32.mrb[17].mxu1 }
 0x1e1   : > { %v1915_v25 = vpop.f32.mrb[18].mxu1 }
 0x1e2   : > { %v1053_v50 = vpack.c.bf16 %v1915_v25, %v1914_v61  ;;  %v928_v51 = vpop.f32.mrb[19].mxu1 }
 0x1e3   : > { %v1052_v52 = vpack.c.bf16 %v928_v51, %v925_v14 }
 0x1e4   : > { %v1077_v55 = vadd.bf16 %v2613_v20, %v1053_v50 }
 0x1e5   : > { %v1076_v56 = vadd.bf16 %v2613_v20, %v1052_v52 }
 0x1e6   : > { %v1093_v58 = vmax.bf16 %v2265_v2, %v1077_v55 }
 0x1e7   : > { %v1092_v57 = vmax.bf16 %v2265_v2, %v1076_v56  ;;  %v2135_v56 = vld [vmem:[%s2822_s5 + $0x30] sm:$0xff]  }
 0x1e8   : > { %2004 = vmatprep.subr.bf16.mxu0 %v2135_v56 }
 0x1e9   : > { %1960 = vmatprep.mubr.bf16.mxu1 %v1092_v57  ;;  %2005 = vmatpush3.bf16.msra.mxu0 %v2135_v56 }
 0x1ea   : > { %1961 = vmatmul.mubr.bf16.vlgmr.msra.gmra.mrb[48].mxu1 %v1093_v58 }
 0x1ef   : > { %v1918_v59 = vpop.f32.mrb[20].mxu1 }
 0x1f0   : > { %v941_v60 = vpop.f32.mrb[21].mxu1 }
 0x1f1   : > { %v1919_v62 = vpop.f32.mrb[22].mxu1 }
 0x1f2   : > { %v1055_v63 = vpack.c.bf16 %v1919_v62, %v1918_v59  ;;  %v944_v0 = vpop.f32.mrb[23].mxu1 }
 0x1f3   : > { %v1054_v1 = vpack.c.bf16 %v944_v0, %v941_v60 }
 0x1f4   : > { %v1079_v3 = vadd.bf16 %v2613_v20, %v1055_v63 }
 0x1f5   : > { %v1078_v4 = vadd.bf16 %v2613_v20, %v1054_v1  ;;  %v2136_v1 = vld [vmem:[%s2822_s5 + $0x38] sm:$0xff]  }
 0x1f6   : > { %v1095_v7 = vmax.bf16 %v2265_v2, %v1079_v3  ;;  %2006 = vmatprep.subr.bf16.mxu0 %v2136_v1 }
 0x1f7   : > { %v1094_v5 = vmax.bf16 %v2265_v2, %v1078_v4  ;;  %2007 = vmatpush3.bf16.msra.mxu0 %v2136_v1 }
 0x1f9   : > { %1964 = vmatprep.mubr.bf16.mxu1 %v1094_v5 }
 0x1fa   : > { %1965 = vmatmul.mubr.bf16.gmra.mrb[52].mxu1 %v1095_v7 }
 0x1ff   : > { %v1922_v8 = vpop.f32.mrb[24].mxu1 }
 0x200   : > { %v957_v9 = vpop.f32.mrb[25].mxu1 }
 0x201   : > { %v1923_v10 = vpop.f32.mrb[26].mxu1 }
 0x202   : > { %v1057_v11 = vpack.c.bf16 %v1923_v10, %v1922_v8  ;;  %v960_v12 = vpop.f32.mrb[27].mxu1 }
 0x203   : > { %v1056_v13 = vpack.c.bf16 %v960_v12, %v957_v9  ;;  %v1808_v9 = vld [vmem:[%s2821_s4 + $0x1] sm:$0x1] }
 0x204   : > { %v1081_v16 = vadd.bf16 %v2613_v20, %v1057_v11  ;;  %v1353_v10 = vpack.i.b16 %v1808_v9, %v1808_v9 }
 0x205   : > { %v1080_v17 = vadd.bf16 %v2613_v20, %v1056_v13 }
 0x206   : > { %v1097_v19 = vmax.bf16 %v2265_v2, %v1081_v16  ;;  %v2657_v13 = vrot.slane %v1353_v10, %v2453_v33 }
 0x207   : > { %v1096_v18 = vmax.bf16 %v2265_v2, %v1080_v17 }
 0x209   : > { %1968 = vmatprep.mubr.bf16.mxu1 %v1096_v18 }
 0x20a   : > { %1969 = vmatmul.mubr.bf16.gmra.mrb[56].mxu1 %v1097_v19 }
 0x20f   : > { %v1926_v21 = vpop.f32.mrb[28].mxu1 }
 0x210   : > { %v973_v22 = vpop.f32.mrb[29].mxu1 }
 0x211   : > { %v1927_v23 = vpop.f32.mrb[30].mxu1 }
 0x212   : > { %v1059_v24 = vpack.c.bf16 %v1927_v23, %v1926_v21  ;;  %v976_v27 = vpop.f32.mrb[31].mxu1 }
 0x213   : > { %v1058_v28 = vpack.c.bf16 %v976_v27, %v973_v22 }
 0x214   : > { %v1083_v29 = vadd.bf16 %v2613_v20, %v1059_v24 }
 0x215   : > { %v1082_v30 = vadd.bf16 %v2613_v20, %v1058_v28 }
 0x216   : > { %v1099_v34 = vmax.bf16 %v2265_v2, %v1083_v29 }
 0x217   : > { %v1098_v32 = vmax.bf16 %v2265_v2, %v1082_v30 }
 0x219   : > { %1972 = vmatprep.mubr.bf16.mxu1 %v1098_v32 }
 0x21a   : > { %1973 = vmatmul.mubr.bf16.gmra.mrb[60].mxu1 %v1099_v34 }
 0x21f   : > { %v1930_v36 = vpop.f32.mrb[32].mxu1 }
 0x220   : > { %v989_v37 = vpop.f32.mrb[33].mxu1 }
 0x221   : > { %v1931_v38 = vpop.f32.mrb[34].mxu1 }
 0x222   : > { %v1061_v39 = vpack.c.bf16 %v1931_v38, %v1930_v36  ;;  %v992_v35 = vpop.f32.mrb[35].mxu1 }
 0x223   : > { %v1060_v40 = vpack.c.bf16 %v992_v35, %v989_v37 }
 0x224   : > { %v1085_v41 = vadd.bf16 %v2613_v20, %v1061_v39 }
 0x225   : > { %v1084_v43 = vadd.bf16 %v2613_v20, %v1060_v40 }
 0x226   : > { %v1101_v45 = vmax.bf16 %v2265_v2, %v1085_v41 }
 0x227   : > { %v1100_v44 = vmax.bf16 %v2265_v2, %v1084_v43 }
 0x229   : > { %1976 = vmatprep.mubr.bf16.mxu1 %v1100_v44 }
 0x22a   : > { %1977 = vmatmul.mubr.bf16.gmra.mrb[64].mxu1 %v1101_v45 }
 0x22f   : > { %v1934_v47 = vpop.f32.mrb[36].mxu1 }
 0x230   : > { %v1005_v48 = vpop.f32.mrb[37].mxu1 }
 0x231   : > { %v1935_v49 = vpop.f32.mrb[38].mxu1 }
 0x232   : > { %v1063_v31 = vpack.c.bf16 %v1935_v49, %v1934_v47  ;;  %v1008_v42 = vpop.f32.mrb[39].mxu1 }
 0x233   : > { %v1062_v54 = vpack.c.bf16 %v1008_v42, %v1005_v48 }
 0x234   : > { %v1087_v6 = vadd.bf16 %v2613_v20, %v1063_v31 }
 0x235   : > { %v1086_v15 = vadd.bf16 %v2613_v20, %v1062_v54 }
 0x236   : > { %v1103_v61 = vmax.bf16 %v2265_v2, %v1087_v6 }
 0x237   : > { %v1938_v26 = vpop.f32.mrb[40].mxu1  ;;  %v1102_v46 = vmax.bf16 %v2265_v2, %v1086_v15 }
 0x238   : > { %v1021_v53 = vpop.f32.mrb[41].mxu1 }
 0x239   : > { %v1939_v14 = vpop.f32.mrb[42].mxu1  ;;  %1980 = vmatprep.mubr.bf16.mxu1 %v1102_v46 }
 0x23a   : > { %v1065_v25 = vpack.c.bf16 %v1939_v14, %v1938_v26  ;;  %v1024_v50 = vpop.f32.mrb[43].mxu1  ;;  %1981 = vmatmul.mubr.bf16.gmra.mrb[68].mxu1 %v1103_v61 }
 0x23b   : > { %v1064_v51 = vpack.c.bf16 %v1024_v50, %v1021_v53 }
 0x23c   : > { %v1089_v52 = vadd.bf16 %v2613_v20, %v1065_v25 }
 0x23d   : > { %v1088_v55 = vadd.bf16 %v2613_v20, %v1064_v51 }
 0x23e   : > { %v1105_v60 = vmax.bf16 %v2265_v2, %v1089_v52 }
 0x23f   : > { %v1942_v57 = vpop.f32.mrb[44].mxu1  ;;  %v1104_v58 = vmax.bf16 %v2265_v2, %v1088_v55 }
 0x240   : > { %v1037_v59 = vpop.f32.mrb[45].mxu1 }
 0x241   : > { %v1943_v62 = vpop.f32.mrb[46].mxu1  ;;  %1984 = vmatprep.mubr.bf16.mxu1 %v1104_v58 }
 0x242   : > { %v1067_v63 = vpack.c.bf16 %v1943_v62, %v1942_v57  ;;  %v1040_v0 = vpop.f32.mrb[47].mxu1  ;;  %1985 = vmatmul.mubr.bf16.gmra.mrb[72].mxu1 %v1105_v60 }
 0x243   : > { %v1066_v3 = vpack.c.bf16 %v1040_v0, %v1037_v59 }
 0x244   : > { %v1091_v4 = vadd.bf16 %v2613_v20, %v1067_v63 }
 0x245   : > { %v1090_v5 = vadd.bf16 %v2613_v20, %v1066_v3 }
 0x246   : > { %v1107_v8 = vmax.bf16 %v2265_v2, %v1091_v4 }
 0x247   : > { %v1106_v7 = vmax.bf16 %v2265_v2, %v1090_v5 }
 0x249   : > { %1988 = vmatprep.mubr.bf16.mxu1 %v1106_v7 }
 0x24a   : > { %1989 = vmatmul.mubr.bf16.gmra.mrb[76].mxu1 %v1107_v8 }
 0x2bd   : > { %v1962_v11 = vpop.f32.mrb[48].mxu1 }
 0x2be   : > { %v1207_v12 = vpop.f32.mrb[49].mxu1 }
 0x2bf   : > { %v1963_v16 = vpop.f32.mrb[50].mxu1 }
 0x2c0   : > { %v1335_v17 = vpack.c.bf16 %v1963_v16, %v1962_v11  ;;  %v1210_v20 = vpop.f32.mrb[51].mxu1 }
 0x2c1   : > { %v1334_v18 = vpack.c.bf16 %v1210_v20, %v1207_v12 }
 0x2c2   : > { %v1360_v19 = vadd.bf16 %v2657_v13, %v1335_v17 }
 0x2c3   : > { %v1359_v21 = vadd.bf16 %v2657_v13, %v1334_v18 }
 0x2c4   : > { %v1376_v23 = vmax.bf16 %v2265_v2, %v1360_v19 }
 0x2c5   : > { %v1375_v22 = vmax.bf16 %v2265_v2, %v1359_v21 }
 0x2c7   : > { %2008 = vmatprep.mubr.bf16.mxu0 %v1375_v22 }
 0x2c8   : > { %2009 = vmatmul.mubr.bf16.vlgmr.msra.gmra.mrb[48].mxu0 %v1376_v23 }
 0x2cd   : > { %v1966_v24 = vpop.f32.mrb[52].mxu1 }
 0x2ce   : > { %v1223_v27 = vpop.f32.mrb[53].mxu1 }
 0x2cf   : > { %v1967_v28 = vpop.f32.mrb[54].mxu1 }
 0x2d0   : > { %v1337_v29 = vpack.c.bf16 %v1967_v28, %v1966_v24  ;;  %v1226_v33 = vpop.f32.mrb[55].mxu1 }
 0x2d1   : > { %v1336_v30 = vpack.c.bf16 %v1226_v33, %v1223_v27 }
 0x2d2   : > { %v1362_v32 = vadd.bf16 %v2657_v13, %v1337_v29 }
 0x2d3   : > { %v1361_v34 = vadd.bf16 %v2657_v13, %v1336_v30 }
 0x2d4   : > { %v1378_v37 = vmax.bf16 %v2265_v2, %v1362_v32 }
 0x2d5   : > { %v1377_v36 = vmax.bf16 %v2265_v2, %v1361_v34 }
 0x2d7   : > { %2012 = vmatprep.mubr.bf16.mxu0 %v1377_v36  ;;  %v2697_v36 = vld [vmem:[%s2823_s6] ss:$0 sm:$0xff] }
 0x2d8   : > { %2013 = vmatmul.mubr.bf16.gmra.mrb[52].mxu0 %v1378_v37 }
 0x2dd   : > { %v1970_v38 = vpop.f32.mrb[56].mxu1 }
 0x2de   : > { %v1239_v39 = vpop.f32.mrb[57].mxu1 }
 0x2df   : > { %v1971_v35 = vpop.f32.mrb[58].mxu1 }
 0x2e0   : > { %v1339_v40 = vpack.c.bf16 %v1971_v35, %v1970_v38  ;;  %v1242_v41 = vpop.f32.mrb[59].mxu1 }
 0x2e1   : > { %v1338_v43 = vpack.c.bf16 %v1242_v41, %v1239_v39 }
 0x2e2   : > { %v1364_v44 = vadd.bf16 %v2657_v13, %v1339_v40 }
 0x2e3   : > { %v1363_v45 = vadd.bf16 %v2657_v13, %v1338_v43 }
 0x2e4   : > { %v1380_v48 = vmax.bf16 %v2265_v2, %v1364_v44 }
 0x2e5   : > { %v1379_v47 = vmax.bf16 %v2265_v2, %v1363_v45 }
 0x2e7   : > { %2016 = vmatprep.mubr.bf16.mxu0 %v1379_v47 }
 0x2e8   : > { %2017 = vmatmul.mubr.bf16.gmra.mrb[56].mxu0 %v1380_v48 }
 0x2ed   : > { %v1974_v49 = vpop.f32.mrb[60].mxu1 }
 0x2ee   : > { %v1255_v31 = vpop.f32.mrb[61].mxu1 }
 0x2ef   : > { %v1975_v42 = vpop.f32.mrb[62].mxu1 }
 0x2f0   : > { %v1341_v54 = vpack.c.bf16 %v1975_v42, %v1974_v49  ;;  %v1258_v6 = vpop.f32.mrb[63].mxu1 }
 0x2f1   : > { %v1340_v15 = vpack.c.bf16 %v1258_v6, %v1255_v31 }
 0x2f2   : > { %v1366_v26 = vadd.bf16 %v2657_v13, %v1341_v54 }
 0x2f3   : > { %v1365_v46 = vadd.bf16 %v2657_v13, %v1340_v15 }
 0x2f4   : > { %v1382_v61 = vmax.bf16 %v2265_v2, %v1366_v26 }
 0x2f5   : > { %v1381_v53 = vmax.bf16 %v2265_v2, %v1365_v46 }
 0x2f7   : > { %2020 = vmatprep.mubr.bf16.mxu0 %v1381_v53 }
 0x2f8   : > { %2021 = vmatmul.mubr.bf16.gmra.mrb[60].mxu0 %v1382_v61 }
 0x2fd   : > { %v1978_v14 = vpop.f32.mrb[64].mxu1 }
 0x2fe   : > { %v1271_v25 = vpop.f32.mrb[65].mxu1 }
 0x2ff   : > { %v1979_v50 = vpop.f32.mrb[66].mxu1 }
 0x300   : > { %v1343_v51 = vpack.c.bf16 %v1979_v50, %v1978_v14  ;;  %v1274_v52 = vpop.f32.mrb[67].mxu1 }
 0x301   : > { %v1342_v55 = vpack.c.bf16 %v1274_v52, %v1271_v25 }
 0x302   : > { %v1368_v56 = vadd.bf16 %v2657_v13, %v1343_v51 }
 0x303   : > { %v1367_v57 = vadd.bf16 %v2657_v13, %v1342_v55 }
 0x304   : > { %v1384_v59 = vmax.bf16 %v2265_v2, %v1368_v56 }
 0x305   : > { %v1383_v58 = vmax.bf16 %v2265_v2, %v1367_v57 }
 0x307   : > { %2024 = vmatprep.mubr.bf16.mxu0 %v1383_v58 }
 0x308   : > { %2025 = vmatmul.mubr.bf16.gmra.mrb[64].mxu0 %v1384_v59 }
 0x30d   : > { %v1982_v60 = vpop.f32.mrb[68].mxu1 }
 0x30e   : > { %v1287_v62 = vpop.f32.mrb[69].mxu1 }
 0x30f   : > { %v1983_v63 = vpop.f32.mrb[70].mxu1 }
 0x310   : > { %v1345_v0 = vpack.c.bf16 %v1983_v63, %v1982_v60  ;;  %v1290_v1 = vpop.f32.mrb[71].mxu1 }
 0x311   : > { %v1344_v3 = vpack.c.bf16 %v1290_v1, %v1287_v62 }
 0x312   : > { %v1370_v4 = vadd.bf16 %v2657_v13, %v1345_v0 }
 0x313   : > { %v1369_v5 = vadd.bf16 %v2657_v13, %v1344_v3 }
 0x314   : > { %v1386_v10 = vmax.bf16 %v2265_v2, %v1370_v4 }
 0x315   : > { %v1986_v7 = vpop.f32.mrb[72].mxu1  ;;  %v1385_v8 = vmax.bf16 %v2265_v2, %v1369_v5 }
 0x316   : > { %v1303_v9 = vpop.f32.mrb[73].mxu1 }
 0x317   : > { %v1987_v11 = vpop.f32.mrb[74].mxu1  ;;  %2028 = vmatprep.mubr.bf16.mxu0 %v1385_v8 }
 0x318   : > { %v1347_v12 = vpack.c.bf16 %v1987_v11, %v1986_v7  ;;  %v1306_v16 = vpop.f32.mrb[75].mxu1  ;;  %2029 = vmatmul.mubr.bf16.gmra.mrb[68].mxu0 %v1386_v10 }
 0x319   : > { %v1346_v17 = vpack.c.bf16 %v1306_v16, %v1303_v9 }
 0x31a   : > { %v1372_v20 = vadd.bf16 %v2657_v13, %v1347_v12 }
 0x31b   : > { %v1371_v18 = vadd.bf16 %v2657_v13, %v1346_v17 }
 0x31c   : > { %v1388_v23 = vmax.bf16 %v2265_v2, %v1372_v20 }
 0x31d   : > { %v1990_v19 = vpop.f32.mrb[76].mxu1  ;;  %v1387_v21 = vmax.bf16 %v2265_v2, %v1371_v18 }
 0x31e   : > { %v1319_v22 = vpop.f32.mrb[77].mxu1 }
 0x31f   : > { %v1991_v24 = vpop.f32.mrb[78].mxu1  ;;  %2032 = vmatprep.mubr.bf16.mxu0 %v1387_v21 }
 0x320   : > { %v1349_v27 = vpack.c.bf16 %v1991_v24, %v1990_v19  ;;  %v1322_v28 = vpop.f32.mrb[79].mxu1  ;;  %2033 = vmatmul.mubr.bf16.gmra.mrb[72].mxu0 %v1388_v23 }
 0x321   : > { %v1348_v29 = vpack.c.bf16 %v1322_v28, %v1319_v22 }
 0x322   : > { %v1374_v33 = vadd.bf16 %v2657_v13, %v1349_v27 }
 0x323   : > { %v1373_v30 = vadd.bf16 %v2657_v13, %v1348_v29 }
 0x324   : > { %v1390_v34 = vmax.bf16 %v2265_v2, %v1374_v33 }
 0x325   : > { %v1389_v32 = vmax.bf16 %v2265_v2, %v1373_v30 }
 0x327   : > { %2036 = vmatprep.mubr.bf16.mxu0 %v1389_v32 }
 0x328   : > { %2037 = vmatmul.mubr.bf16.gmra.mrb[76].mxu0 %v1390_v34 }
 0x39b   : > { %v2010_v37 = vpop.f32.mrb[48].mxu0 }
 0x39c   : > { %v1505_v38 = vadd.f32 %v2010_v37, %v2697_v36  ;;  %v1496_v39 = vpop.f32.mrb[49].mxu0 }
 0x39d   : > { %v1497_v13 = vadd.f32 %v2697_v36, %v1496_v39  ;;  %v2011_v35 = vpop.f32.mrb[50].mxu0 }
 0x39e   : > { %1625 = vst [vmem:[%s2701_s15 + $0x10] sm:$0xff] %v1505_v38  ;;  %v1508_v2 = vadd.f32 %v2011_v35, %v2697_v36  ;;  %v1499_v40 = vpop.f32.mrb[51].mxu0 }
 0x39f   : > { %1623 = vst [vmem:[%s2701_s15] sm:$0xff] %v1497_v13  ;;  %v1500_v41 = vadd.f32 %v2697_v36, %v1499_v40 }
 0x3a0   : > { %1626 = vst [vmem:[%s2701_s15 + $0x18] sm:$0xff] %v1508_v2 }
 0x3a1   : > { %1624 = vst [vmem:[%s2701_s15 + $0x8] sm:$0xff] %v1500_v41 }
 0x3ab   : > { %v2014_v43 = vpop.f32.mrb[52].mxu0 }
 0x3ac   : > { %v1521_v44 = vadd.f32 %v2014_v43, %v2697_v36  ;;  %v1512_v45 = vpop.f32.mrb[53].mxu0 }
 0x3ad   : > { %v1513_v47 = vadd.f32 %v2697_v36, %v1512_v45  ;;  %v2015_v48 = vpop.f32.mrb[54].mxu0 }
 0x3ae   : > { %1629 = vst [vmem:[%s2701_s15 + $0x30] sm:$0xff] %v1521_v44  ;;  %v1524_v49 = vadd.f32 %v2015_v48, %v2697_v36  ;;  %v1515_v31 = vpop.f32.mrb[55].mxu0 }
 0x3af   : > { %1627 = vst [vmem:[%s2701_s15 + $0x20] sm:$0xff] %v1513_v47  ;;  %v1516_v42 = vadd.f32 %v2697_v36, %v1515_v31 }
 0x3b0   : > { %1630 = vst [vmem:[%s2701_s15 + $0x38] sm:$0xff] %v1524_v49 }
 0x3b1   : > { %1628 = vst [vmem:[%s2701_s15 + $0x28] sm:$0xff] %v1516_v42 }
 0x3bb   : > { %v2018_v54 = vpop.f32.mrb[56].mxu0 }
 0x3bc   : > { %v1537_v6 = vadd.f32 %v2018_v54, %v2697_v36  ;;  %v1528_v15 = vpop.f32.mrb[57].mxu0 }
 0x3bd   : > { %v1529_v26 = vadd.f32 %v2697_v36, %v1528_v15  ;;  %v2019_v46 = vpop.f32.mrb[58].mxu0 }
 0x3be   : > { %1633 = vst [vmem:[%s2701_s15 + $0x50] sm:$0xff] %v1537_v6  ;;  %v1540_v53 = vadd.f32 %v2019_v46, %v2697_v36  ;;  %v1531_v61 = vpop.f32.mrb[59].mxu0 }
 0x3bf   : > { %1631 = vst [vmem:[%s2701_s15 + $0x40] sm:$0xff] %v1529_v26  ;;  %v1532_v14 = vadd.f32 %v2697_v36, %v1531_v61 }
 0x3c0   : > { %1634 = vst [vmem:[%s2701_s15 + $0x58] sm:$0xff] %v1540_v53 }
 0x3c1   : > { %1632 = vst [vmem:[%s2701_s15 + $0x48] sm:$0xff] %v1532_v14 }
 0x3cb   : > { %v2022_v25 = vpop.f32.mrb[60].mxu0 }
 0x3cc   : > { %v1553_v50 = vadd.f32 %v2022_v25, %v2697_v36  ;;  %v1544_v51 = vpop.f32.mrb[61].mxu0 }
 0x3cd   : > { %v1545_v52 = vadd.f32 %v2697_v36, %v1544_v51  ;;  %v2023_v55 = vpop.f32.mrb[62].mxu0 }
 0x3ce   : > { %1637 = vst [vmem:[%s2701_s15 + $0x70] sm:$0xff] %v1553_v50  ;;  %v1556_v56 = vadd.f32 %v2023_v55, %v2697_v36  ;;  %v1547_v57 = vpop.f32.mrb[63].mxu0 }
 0x3cf   : > { %1635 = vst [vmem:[%s2701_s15 + $0x60] sm:$0xff] %v1545_v52  ;;  %v1548_v58 = vadd.f32 %v2697_v36, %v1547_v57 }
 0x3d0   : > { %1638 = vst [vmem:[%s2701_s15 + $0x78] sm:$0xff] %v1556_v56 }
 0x3d1   : > { %1636 = vst [vmem:[%s2701_s15 + $0x68] sm:$0xff] %v1548_v58 }
 0x3db   : > { %v2026_v59 = vpop.f32.mrb[64].mxu0 }
 0x3dc   : > { %v1569_v60 = vadd.f32 %v2026_v59, %v2697_v36  ;;  %v1560_v62 = vpop.f32.mrb[65].mxu0 }
 0x3dd   : > { %v1561_v63 = vadd.f32 %v2697_v36, %v1560_v62  ;;  %v2027_v0 = vpop.f32.mrb[66].mxu0 }
 0x3de   : > { %1641 = vst [vmem:[%s2701_s15 + $0x90] sm:$0xff] %v1569_v60  ;;  %v1572_v1 = vadd.f32 %v2027_v0, %v2697_v36  ;;  %v1563_v3 = vpop.f32.mrb[67].mxu0 }
 0x3df   : > { %1639 = vst [vmem:[%s2701_s15 + $0x80] sm:$0xff] %v1561_v63  ;;  %v1564_v4 = vadd.f32 %v2697_v36, %v1563_v3 }
 0x3e0   : > { %1642 = vst [vmem:[%s2701_s15 + $0x98] sm:$0xff] %v1572_v1 }
 0x3e1   : > { %1640 = vst [vmem:[%s2701_s15 + $0x88] sm:$0xff] %v1564_v4 }
 0x3eb   : > { %v2030_v5 = vpop.f32.mrb[68].mxu0 }
 0x3ec   : > { %v1585_v7 = vadd.f32 %v2030_v5, %v2697_v36  ;;  %v1576_v8 = vpop.f32.mrb[69].mxu0 }
 0x3ed   : > { %v1577_v9 = vadd.f32 %v2697_v36, %v1576_v8  ;;  %v2031_v10 = vpop.f32.mrb[70].mxu0 }
 0x3ee   : > { %1645 = vst [vmem:[%s2701_s15 + $0xb0] sm:$0xff] %v1585_v7  ;;  %v1588_v11 = vadd.f32 %v2031_v10, %v2697_v36  ;;  %v1579_v12 = vpop.f32.mrb[71].mxu0 }
 0x3ef   : > { %1643 = vst [vmem:[%s2701_s15 + $0xa0] sm:$0xff] %v1577_v9  ;;  %v1580_v16 = vadd.f32 %v2697_v36, %v1579_v12 }
 0x3f0   : > { %1646 = vst [vmem:[%s2701_s15 + $0xb8] sm:$0xff] %v1588_v11 }
 0x3f1   : > { %1644 = vst [vmem:[%s2701_s15 + $0xa8] sm:$0xff] %v1580_v16 }
 0x3f3   : > { %v2034_v17 = vpop.f32.mrb[72].mxu0 }
 0x3f4   : > { %v1601_v20 = vadd.f32 %v2034_v17, %v2697_v36  ;;  %v1592_v18 = vpop.f32.mrb[73].mxu0 }
 0x3f5   : > { %v1593_v19 = vadd.f32 %v2697_v36, %v1592_v18  ;;  %v2035_v21 = vpop.f32.mrb[74].mxu0 }
 0x3f6   : > { %1649 = vst [vmem:[%s2701_s15 + $0xd0] sm:$0xff] %v1601_v20  ;;  %v1604_v22 = vadd.f32 %v2035_v21, %v2697_v36  ;;  %v1595_v23 = vpop.f32.mrb[75].mxu0 }
 0x3f7   : > { %1647 = vst [vmem:[%s2701_s15 + $0xc0] sm:$0xff] %v1593_v19  ;;  %v1596_v24 = vadd.f32 %v2697_v36, %v1595_v23 }
 0x3f8   : > { %1650 = vst [vmem:[%s2701_s15 + $0xd8] sm:$0xff] %v1604_v22 }
 0x3f9   : > { %1648 = vst [vmem:[%s2701_s15 + $0xc8] sm:$0xff] %v1596_v24 }
 0x3fb   : > { %v2038_v27 = vpop.f32.mrb[76].mxu0 }
 0x3fc   : > { %v1617_v28 = vadd.f32 %v2038_v27, %v2697_v36  ;;  %v1608_v29 = vpop.f32.mrb[77].mxu0 }
 0x3fd   : > { %v1609_v33 = vadd.f32 %v2697_v36, %v1608_v29  ;;  %v2039_v30 = vpop.f32.mrb[78].mxu0 }
 0x3fe   : > { %1653 = vst [vmem:[%s2701_s15 + $0xf0] sm:$0xff] %v1617_v28  ;;  %v1620_v32 = vadd.f32 %v2039_v30, %v2697_v36  ;;  %v1611_v34 = vpop.f32.mrb[79].mxu0 }
 0x3ff   : > { %1651 = vst [vmem:[%s2701_s15 + $0xe0] sm:$0xff] %v1609_v33  ;;  %v1612_v37 = vadd.f32 %v2697_v36, %v1611_v34 }
 0x400   : > { %1654 = vst [vmem:[%s2701_s15 + $0xf8] sm:$0xff] %v1620_v32 }
 0x401   : > { %1652 = vst [vmem:[%s2701_s15 + $0xe8] sm:$0xff] %v1612_v37 }
 0x402   : > { %2214 = shalt.err (!%p2211_p3)
}
 0x403   : > { %s2215_s14 = scalar_lea.hbm %s2766_s23, 4096  ;;  %s2219_s18 = scalar_lea.hbm %s2824_s7, 8192 }
 0x404   : > { %p2216_p4 = scmp.ne.s32.totalorder %s2766_s23, %s2215_s14  ;;  %p2220_p9 = scmp.lt.u32.totalorder %s2766_s23, %s2824_s7 }
 0x405   : > { %p2221_p10 = scmp.lt.u32.totalorder %s2219_s18, %s2215_s14  ;;  %p2223_p12 = scmp.lt.u32.totalorder %s2215_s14, %s2766_s23 }
 0x406   : > { %p2217_p7 = pnand %p2216_p4, %p2347_p5 }
 0x407   : > { %p2222_p11 = por %p2221_p10, %p2220_p9 }
 0x408   : > { %p2218_p8 = pneg %p2217_p7 }
 0x409   : > { %p2224_p13 = por %p2223_p12, %p2222_p11 }
 0x40b   : > { %p2225_p0 = pnand %p2224_p13, %p2218_p8 }
 0x40d   : > { %2228 = shalt.err (!%p2225_p0)
}
 0x40e   : > { %s2267_s21 = smov 128   ;;  %s2268_s22 = smov 8  }
 0x40f   : > { %2046 = dma.vmem_to_hbm [thread:$0]  (%p2347_p5), %s2768_s20, 4096, %s2766_s23, %s2776_s28, %s2267_s21, %s2267_s21, %s2268_s22  }
 0x410 PF: > { %p2052_p1 = scmp.ge.s32.totalorder %s2263_s27, 2  ;;  %s1684_s29 = sand.u32 1, %s2251_s24  }
 0x411   : > { %s1685_s8 = scalar_lea.sflag [#allocation3], %s1684_s29 }
 0x412   : > { %p2049_p2 = pnand %p2052_p1, %p2351_p6 }
 0x414   : > { %2246 = dma.done.wait (!%p2049_p2), %s1685_s8, 4096  }
 0x415   : > { %2248 = vsyncadd (!%p2049_p2), %s1685_s8, 4294963200  ;;  %p17_p3 = scmp.ge.s32.totalorder %s2334_s30, 4   ;;  %s2827_s24 = smov %s2255_s25 }
 0x416   : > { %s2828_s25 = smov %s2259_s26  ;;  %s2829_s26 = smov %s2345_s10 }
 0x417   : > { %s2830_s27 = smov %s2334_s30  ;;  %19 = sbr.rel (!%p17_p3) target bundleno = 3 (0x3), region = 85 }
 0x41e   :  { %1690 = vsyncpa [#allocation3], 1 }
 0x41f   :  { %1692 = vsyncpa [#allocation3 + $0x1], 1 }

</bundles_post_ra>
